<compile_context>
chip_gen: v7x
topology: tpu7x:2x2x1
jax: 0.10.0
libtpu: 0.0.40
codegen_flags: <defaults>
</compile_context>

<pallas_src>
import math
from functools import partial

import jax
import jax.numpy as jnp
from jax import lax
from jax.experimental import pallas as pl
from jax.experimental.pallas import tpu as pltpu

EPS_BN = 1e-5  # PyTorch BatchNorm2d default eps


# ----------------------------- Pallas kernel ---------------------------------


def _conv_bn_relu_kernel(p_ref, w_ref, b_ref, g_ref, be_ref, o_ref):
    """Fused im2col-matmul + bias + BatchNorm(batch stats) + ReLU.

    p_ref : (M, K)    bf16   im2col patches, M = B*Ho*Wo, K = Fin*kh*kw
    w_ref : (K, Fout) bf16   reshaped conv weight
    b_ref : (1, Fout) f32    conv bias
    g_ref : (1, Fout) f32    BN gamma
    be_ref: (1, Fout) f32    BN beta
    o_ref : (M, Fout) f32    output (channels-last)
    """
    # MXU: bf16 operands, f32 accumulation.
    y = jnp.dot(p_ref[...], w_ref[...], preferred_element_type=jnp.float32)
    y = y + b_ref[...]                                          # conv bias (VPU, free)

    # BatchNorm2d training-mode statistics: per-channel over (B, Ho, Wo) == rows.
    mean = jnp.mean(y, axis=0, keepdims=True)
    var = jnp.mean(jnp.square(y - mean), axis=0, keepdims=True)  # biased variance
    yn = (y - mean) * lax.rsqrt(var + EPS_BN)

    # Affine + ReLU, fused epilogue.
    o_ref[...] = jnp.maximum(yn * g_ref[...] + be_ref[...], 0.0)


# ----------------------------- wrapper ----------------------------------------


def _im2col(x, kh, kw, sh, sw):
    """x: (B, Fin, H, W) -> patches (B*Ho*Wo, Fin*kh*kw), channels-last feature order."""
    Bq, Fin, H, W = x.shape
    Ho = (H - kh) // sh + 1
    Wo = (W - kw) // sw + 1
    cols = []
    for di in range(kh):
        for dj in range(kw):
            sl = x[:, :, di:di + (Ho - 1) * sh + 1:sh, dj:dj + (Wo - 1) * sw + 1:sw]
            cols.append(sl)                                   # (B, Fin, Ho, Wo)
    p = jnp.stack(cols, axis=-1)                              # (B, Fin, Ho, Wo, kh*kw)
    p = jnp.transpose(p, (0, 2, 3, 1, 4))                     # (B, Ho, Wo, Fin, kh*kw)
    return p.reshape(Bq * Ho * Wo, Fin * kh * kw), Ho, Wo


def conv2dbr_forward(params, x, *, kernel_size, stride=1):
    """conv2dbr forward: [B, Fin, H, W] -> [B, Fout, Ho, Wo]."""
    kh, kw = (kernel_size, kernel_size) if isinstance(kernel_size, int) else kernel_size
    sh, sw = (stride, stride) if isinstance(stride, int) else stride
    Bq, Fin, H, W = x.shape
    w = params["conv_w"]                                      # (Fout, Fin, kh, kw)
    Fout = w.shape[0]

    patches, Ho, Wo = _im2col(x.astype(jnp.float32), kh, kw, sh, sw)
    M, K = patches.shape
    w2 = jnp.transpose(w.reshape(Fout, K))                    # (K, Fout), matching im2col order

    # bf16 MXU operands (halves DMA bytes), f32 accumulation inside the kernel.
    patches_bf = patches.astype(jnp.bfloat16)
    w2_bf = w2.astype(jnp.bfloat16)
    bias2d = params["conv_b"].reshape(1, Fout).astype(jnp.float32)
    gamma2d = params["bn_g"].reshape(1, Fout).astype(jnp.float32)
    beta2d = params["bn_b"].reshape(1, Fout).astype(jnp.float32)

    # Whole problem fits VMEM comfortably at these sizes -> single fused launch.
    vmem_bytes = 2 * (M * K + K * Fout) + 4 * (M * Fout + 3 * Fout)
    assert vmem_bytes < 8 * 1024 * 1024  # TODO(synk): add M/K tiling + two-pass BN stats for large shapes

    y2d = pl.pallas_call(
        _conv_bn_relu_kernel,
        out_shape=jax.ShapeDtypeStruct((M, Fout), jnp.float32),
        grid=(1,),
        in_specs=[pl.BlockSpec((M, K), lambda i: (0, 0)),
                  pl.BlockSpec((K, Fout), lambda i: (0, 0)),
                  pl.BlockSpec((1, Fout), lambda i: (0, 0)),
                  pl.BlockSpec((1, Fout), lambda i: (0, 0)),
                  pl.BlockSpec((1, Fout), lambda i: (0, 0))],
        out_specs=pl.BlockSpec((M, Fout), lambda i: (0, 0)),
        compiler_params=pltpu.CompilerParams(dimension_semantics=("arbitrary",)),
    )(patches_bf, w2_bf, bias2d, gamma2d, beta2d)

    # Back to PyTorch NCHW layout (pure layout glue, outside the kernel).
    return jnp.transpose(y2d.reshape(Bq, Ho, Wo, Fout), (0, 3, 1, 2))


# ----------------------------- pure-JAX reference ------------------------------


def conv2dbr_reference(params, x, *, kernel_size, stride=1):
    kh, kw = (kernel_size, kernel_size) if isinstance(kernel_size, int) else kernel_size
    sh, sw = (stride, stride) if isinstance(stride, int) else stride
    y = lax.conv_general_dilated(
        x.astype(jnp.float32), params["conv_w"].astype(jnp.float32),
        window_strides=(sh, sw), padding="VALID",
        dimension_numbers=("NCHW", "OIHW", "NCHW"))
    y = y + params["conv_b"][None, :, None, None]
    mean = jnp.mean(y, axis=(0, 2, 3), keepdims=True)
    var = jnp.mean(jnp.square(y - mean), axis=(0, 2, 3), keepdims=True)
    yn = (y - mean) * lax.rsqrt(var + EPS_BN)
    g = params["bn_g"][None, :, None, None]
    b = params["bn_b"][None, :, None, None]
    return jnp.maximum(yn * g + b, 0.0)


# ----------------------------- main --------------------------------------------

if __name__ == "__main__":
    # Small shapes consistent with the module: [B, Fin, H, W] -> [B, Fout, Ho, Wo]
    B, FIN, FOUT, H, W = 2, 32, 128, 16, 16
    KSIZE, STRIDE = 3, 1

    key = jax.random.PRNGKey(0)
    kx, kwt, kbs = jax.random.split(key, 3)
    fan_in = FIN * KSIZE * KSIZE
    bound = 1.0 / math.sqrt(fan_in)
    params = {
        # PyTorch Conv2d default init ranges; BN defaults weight=1, bias=0.
        "conv_w": jax.random.uniform(kwt, (FOUT, FIN, KSIZE, KSIZE), jnp.float32, -bound, bound),
        "conv_b": jax.random.uniform(kbs, (FOUT,), jnp.float32, -bound, bound),
        "bn_g": jnp.ones((FOUT,), jnp.float32),
        "bn_b": jnp.zeros((FOUT,), jnp.float32),
    }
    x = jax.random.normal(kx, (B, FIN, H, W), jnp.float32)

    fwd = jax.jit(partial(conv2dbr_forward, kernel_size=KSIZE, stride=STRIDE))
    out = jax.block_until_ready(fwd(params, x))

    Ho = (H - KSIZE) // STRIDE + 1
    Wo = (W - KSIZE) // STRIDE + 1
    assert out.shape == (B, FOUT, Ho, Wo), out.shape
    assert bool(jnp.all(jnp.isfinite(out)))

    ref = conv2dbr_reference(params, x, kernel_size=KSIZE, stride=STRIDE)
    max_err = float(jnp.max(jnp.abs(out - ref)))
    assert max_err < 0.1, f"max abs err {max_err}"

    print("KERNEL_OK")
</pallas_src>

<mosaic_0001>
module attributes {stable_mosaic.version = 11 : i64} {
  func.func @_conv_bn_relu_kernel(%arg0: i32, %arg1: memref<392x288xbf16, #tpu.memory_space<vmem>>, %arg2: memref<288x128xbf16, #tpu.memory_space<vmem>>, %arg3: memref<1x128xf32, #tpu.memory_space<vmem>>, %arg4: memref<1x128xf32, #tpu.memory_space<vmem>>, %arg5: memref<1x128xf32, #tpu.memory_space<vmem>>, %arg6: memref<392x128xf32, #tpu.memory_space<vmem>>) attributes {dimension_semantics = [#tpu.dimension_semantics<arbitrary>], iteration_bounds = array<i64: 1>, scalar_prefetch = 0 : i64, scratch_operands = 0 : i64, tpu.core_type = #tpu.core_type<tc>, window_params = [{pipeline_mode = #tpu.pipeline_mode<synchronous>, transform_indices = @transform_0, window_bounds = array<i64: 392, 288>}, {pipeline_mode = #tpu.pipeline_mode<synchronous>, transform_indices = @transform_1, window_bounds = array<i64: 288, 128>}, {pipeline_mode = #tpu.pipeline_mode<synchronous>, transform_indices = @transform_2, window_bounds = array<i64: 1, 128>}, {pipeline_mode = #tpu.pipeline_mode<synchronous>, transform_indices = @transform_3, window_bounds = array<i64: 1, 128>}, {pipeline_mode = #tpu.pipeline_mode<synchronous>, transform_indices = @transform_4, window_bounds = array<i64: 1, 128>}, {pipeline_mode = #tpu.pipeline_mode<synchronous>, transform_indices = @transform_5, window_bounds = array<i64: 392, 128>}]} {
    %c0 = arith.constant 0 : index
    %c0_0 = arith.constant 0 : index
    %0 = vector.load %arg1[%c0, %c0_0] : memref<392x288xbf16, #tpu.memory_space<vmem>>, vector<392x288xbf16>
    %c0_1 = arith.constant 0 : index
    %c0_2 = arith.constant 0 : index
    %1 = vector.load %arg2[%c0_1, %c0_2] : memref<288x128xbf16, #tpu.memory_space<vmem>>, vector<288x128xbf16>
    %cst = arith.constant dense<0.000000e+00> : vector<392x128xf32>
    %2 = tpu.matmul %0, %1, %cst {dimension_numbers = #tpu.dot_dimension_numbers<[1], [0], [0], [1], [0, 0, 1, 1], [], []>} : vector<392x288xbf16>, vector<288x128xbf16>, vector<392x128xf32> -> vector<392x128xf32>
    %c0_3 = arith.constant 0 : index
    %c0_4 = arith.constant 0 : index
    %3 = vector.load %arg3[%c0_3, %c0_4] : memref<1x128xf32, #tpu.memory_space<vmem>>, vector<1x128xf32>
    %4 = vector.broadcast %3 : vector<1x128xf32> to vector<392x128xf32>
    %5 = arith.addf %2, %4 : vector<392x128xf32>
    %cst_5 = arith.constant dense<0.000000e+00> : vector<128xf32>
    %6 = vector.multi_reduction <add>, %5, %cst_5 [0] : vector<392x128xf32> to vector<128xf32>
    %7 = vector.shape_cast %6 : vector<128xf32> to vector<1x128xf32>
    %cst_6 = arith.constant 3.920000e+02 : f32
    %8 = vector.broadcast %cst_6 : f32 to vector<1x128xf32>
    %9 = arith.divf %7, %8 : vector<1x128xf32>
    %10 = vector.broadcast %9 : vector<1x128xf32> to vector<392x128xf32>
    %11 = arith.subf %5, %10 : vector<392x128xf32>
    %12 = arith.mulf %11, %11 : vector<392x128xf32>
    %cst_7 = arith.constant dense<0.000000e+00> : vector<128xf32>
    %13 = vector.multi_reduction <add>, %12, %cst_7 [0] : vector<392x128xf32> to vector<128xf32>
    %14 = vector.shape_cast %13 : vector<128xf32> to vector<1x128xf32>
    %cst_8 = arith.constant 3.920000e+02 : f32
    %15 = vector.broadcast %cst_8 : f32 to vector<1x128xf32>
    %16 = arith.divf %14, %15 : vector<1x128xf32>
    %17 = vector.broadcast %9 : vector<1x128xf32> to vector<392x128xf32>
    %18 = arith.subf %5, %17 : vector<392x128xf32>
    %cst_9 = arith.constant 9.99999974E-6 : f32
    %19 = vector.broadcast %cst_9 : f32 to vector<1x128xf32>
    %20 = arith.addf %16, %19 : vector<1x128xf32>
    %21 = math.rsqrt %20 : vector<1x128xf32>
    %22 = vector.broadcast %21 : vector<1x128xf32> to vector<392x128xf32>
    %23 = arith.mulf %18, %22 : vector<392x128xf32>
    %c0_10 = arith.constant 0 : index
    %c0_11 = arith.constant 0 : index
    %24 = vector.load %arg4[%c0_10, %c0_11] : memref<1x128xf32, #tpu.memory_space<vmem>>, vector<1x128xf32>
    %25 = vector.broadcast %24 : vector<1x128xf32> to vector<392x128xf32>
    %26 = arith.mulf %23, %25 : vector<392x128xf32>
    %c0_12 = arith.constant 0 : index
    %c0_13 = arith.constant 0 : index
    %27 = vector.load %arg5[%c0_12, %c0_13] : memref<1x128xf32, #tpu.memory_space<vmem>>, vector<1x128xf32>
    %28 = vector.broadcast %27 : vector<1x128xf32> to vector<392x128xf32>
    %29 = arith.addf %26, %28 : vector<392x128xf32>
    %cst_14 = arith.constant 0.000000e+00 : f32
    %30 = vector.broadcast %cst_14 : f32 to vector<392x128xf32>
    %31 = arith.maximumf %29, %30 : vector<392x128xf32>
    %c0_15 = arith.constant 0 : index
    %c0_16 = arith.constant 0 : index
    %32 = vector.load %arg6[%c0_15, %c0_16] : memref<392x128xf32, #tpu.memory_space<vmem>>, vector<392x128xf32>
    tpu.vector_store %arg6[%c0_15, %c0_16], %31 {strides = array<i32>} : memref<392x128xf32, #tpu.memory_space<vmem>>, vector<392x128xf32>,
    return
  }
  func.func @transform_0(%arg0: i32) -> (i32, i32) {
    %c0_i32 = arith.constant 0 : i32
    %c0_i32_0 = arith.constant 0 : i32
    %c0_i32_1 = arith.constant 0 : i32
    return %c0_i32, %c0_i32_0 : i32, i32
  }
  func.func @transform_1(%arg0: i32) -> (i32, i32) {
    %c0_i32 = arith.constant 0 : i32
    %c0_i32_0 = arith.constant 0 : i32
    %c0_i32_1 = arith.constant 0 : i32
    return %c0_i32, %c0_i32_0 : i32, i32
  }
  func.func @transform_2(%arg0: i32) -> (i32, i32) {
    %c0_i32 = arith.constant 0 : i32
    %c0_i32_0 = arith.constant 0 : i32
    %c0_i32_1 = arith.constant 0 : i32
    return %c0_i32, %c0_i32_0 : i32, i32
  }
  func.func @transform_3(%arg0: i32) -> (i32, i32) {
    %c0_i32 = arith.constant 0 : i32
    %c0_i32_0 = arith.constant 0 : i32
    %c0_i32_1 = arith.constant 0 : i32
    return %c0_i32, %c0_i32_0 : i32, i32
  }
  func.func @transform_4(%arg0: i32) -> (i32, i32) {
    %c0_i32 = arith.constant 0 : i32
    %c0_i32_0 = arith.constant 0 : i32
    %c0_i32_1 = arith.constant 0 : i32
    return %c0_i32, %c0_i32_0 : i32, i32
  }
  func.func @transform_5(%arg0: i32) -> (i32, i32) {
    %c0_i32 = arith.constant 0 : i32
    %c0_i32_0 = arith.constant 0 : i32
    %c0_i32_1 = arith.constant 0 : i32
    return %c0_i32, %c0_i32_0 : i32, i32
  }
}

</mosaic_0001>

<bundles_post_ra>
// kernel: conv2dbr_forward.1
= control target key start
LH: loop header
LB: loop body
LE: loop exit
PB: predicated region body
PF: predicated region fallthrough
CT: control target
= control target key end

     0   :  { %v2126_v0 = vmov 0   ;;  %v2127_v2 = vmov 0.0   ;;  %vm2128_vm0 = vmmov 0   ;;  %vm640_vm1 = vcmask 261120   ;;  %s3448_s1 = inlined_call_operand.vmem [shape: bf16[288,128], index: 1, kind: input, shape index: {}]   ;;  %s3449_s0 = inlined_call_operand.vmem [shape: bf16[392,288], index: 0, kind: input, shape index: {}]   ;;  %s3450_s2 = inlined_call_operand.vmem [shape: f32[1,128], index: 2, kind: input, shape index: {}]   ;;  %s3451_s3 = inlined_call_operand.vmem [shape: f32[1,128], index: 3, kind: input, shape index: {}]   ;;  %s3452_s4 = inlined_call_operand.vmem [shape: f32[1,128], index: 4, kind: input, shape index: {}]   ;;  %s3453_s5 = inlined_call_operand.vmem [shape: f32[392,128], index: 5, kind: output, shape index: {}]  }
   0x1   :  { %716 = vmatprep.subr.bf16.mxu1 %v2126_v0  ;;  %v2007_v1 = vld [vmem:[%s3448_s1] sm:$0xff]   ;;  %1802 = vmatprep.subr.bf16.mxu0 %v2127_v2  ;;  %v2008_v3 = vld [vmem:[%s3448_s1 + $0x8] sm:$0xff]   ;;  %v2009_v4 = vld [vmem:[%s3448_s1 + $0x10] sm:$0xff]  }
   0x2   :  { %1806 = vmatprep.mubr.msk.bf16.mxu0 %vm2128_vm0, %v2127_v2  ;;  %717 = vmatpush1.bf16.msra.mxu1 %v2007_v1  ;;  %v2010_v5 = vld [vmem:[%s3448_s1 + $0x18] sm:$0xff]   ;;  %v2011_v6 = vld [vmem:[%s3448_s1 + $0x20] sm:$0xff]   ;;  %v2023_v8 = vld [vmem:[%s3448_s1 + $0x88] sm:$0xff]  }
   0x3   :  { %718 = vmatprep.subr.bf16.mxu1 %v2126_v0  ;;  %v2021_v7 = vld [vmem:[%s3448_s1 + $0x80] sm:$0xff]   ;;  %v2012_v9 = vld [vmem:[%s3448_s1 + $0x28] sm:$0xff]   ;;  %v2013_v12 = vld [vmem:[%s3448_s1 + $0x30] sm:$0xff]  }
   0x4   :  { %1803 = vmatpush3.bf16.msra.mxu0 %v2021_v7  ;;  %v2027_v10 = vld [vmem:[%s3449_s0 + $0x4] ss:$12 sps:$4 sm:$0xff]   ;;  %v2028_v11 = vld [vmem:[%s3449_s0 + $0x8] ss:$12 sps:$4 sm:$0xff]   ;;  %v2014_v13 = vld [vmem:[%s3448_s1 + $0x38] sm:$0xff]  }
   0x5   :  { %1804 = vmatprep.subr.bf16.mxu0 %v2127_v2  ;;  %748 = vmatprep.mubr.bf16.mxu1 %v2027_v10  ;;  %v2031_v14 = vld [vmem:[%s3449_s0 + $0x20] ss:$12 sps:$4 sm:$0xff]   ;;  %v2035_v17 = vld [vmem:[%s3449_s0 + $0x38] ss:$12 sps:$4 sm:$0xff]   ;;  %v2017_v18 = vld [vmem:[%s3448_s1 + $0x50] sm:$0xff]  }
   0x6   :  { %719 = vmatpush1.bf16.msra.mxu1 %v2008_v3  ;;  %v2015_v15 = vld [vmem:[%s3448_s1 + $0x40] sm:$0xff]   ;;  %v2016_v16 = vld [vmem:[%s3448_s1 + $0x48] sm:$0xff]   ;;  %v2018_v19 = vld [vmem:[%s3448_s1 + $0x58] sm:$0xff]  }
   0x7   :  { %720 = vmatprep.subr.bf16.mxu1 %v2126_v0  ;;  %v2039_v20 = vld [vmem:[%s3449_s0 + $0x50] ss:$12 sps:$4 sm:$0xff]   ;;  %v2019_v21 = vld [vmem:[%s3448_s1 + $0x60] sm:$0xff]   ;;  %v2020_v22 = vld [vmem:[%s3448_s1 + $0x68] sm:$0xff]  }
   0x8   :  { %1805 = vmatpush3.bf16.msra.mxu0 %v2023_v8  ;;  %v2043_v23 = vld [vmem:[%s3449_s0 + $0x68] ss:$12 sps:$4 sm:$0xff]   ;;  %v2024_v25 = vld [vmem:[%s3448_s1 + $0x78] sm:$0xff]   ;;  %v2047_v26 = vld [vmem:[%s3449_s0 + $0x80] ss:$12 sps:$4 sm:$0xff]  }
   0x9   :  { %v2022_v24 = vld [vmem:[%s3448_s1 + $0x70] sm:$0xff]   ;;  %v2025_v27 = vld [vmem:[%s3449_s0] ss:$12 sps:$4 sm:$0xff]   ;;  %v2029_v28 = vld [vmem:[%s3449_s0 + $0x1c] ss:$12 sps:$4 sm:$0xff]  }
   0xa   :  { %721 = vmatpush1.bf16.msra.mxu1 %v2009_v4  ;;  %v2051_v29 = vld [vmem:[%s3449_s0 + $0x98] ss:$12 sps:$4 sm:$0xff]   ;;  %v2033_v31 = vld [vmem:[%s3449_s0 + $0x34] ss:$12 sps:$4 sm:$0xff]   ;;  %v2055_v32 = vld [vmem:[%s3449_s0 + $0xb0] ss:$12 sps:$4 sm:$0xff]  }
   0xb   :  { %722 = vmatprep.subr.bf16.mxu1 %v2126_v0  ;;  %1807 = vmatmul.mubr.msk.bf16.vlgmr.msra.gmra.mrb[0].mxu0 %vm640_vm1, %v2028_v11  ;;  %v2032_v30 = vld [vmem:[%s3449_s0 + $0x18] ss:$12 sps:$4 sm:$0xff]   ;;  %v2036_v33 = vld [vmem:[%s3449_s0 + $0x30] ss:$12 sps:$4 sm:$0xff]   ;;  %v2059_v35 = vld [vmem:[%s3449_s0 + $0xc8] ss:$12 sps:$4 sm:$0xff]  }
   0xc   :  { %1810 = vmatprep.mubr.msk.bf16.mxu0 %vm2128_vm0, %v2127_v2  ;;  %v2037_v34 = vld [vmem:[%s3449_s0 + $0x4c] ss:$12 sps:$4 sm:$0xff]   ;;  %v2040_v36 = vld [vmem:[%s3449_s0 + $0x48] ss:$12 sps:$4 sm:$0xff]   ;;  %v2041_v37 = vld [vmem:[%s3449_s0 + $0x64] ss:$12 sps:$4 sm:$0xff]  }
   0xd   :  { %v2063_v38 = vld [vmem:[%s3449_s0 + $0xe0] ss:$12 sps:$4 sm:$0xff]   ;;  %v2045_v40 = vld [vmem:[%s3449_s0 + $0x7c] ss:$12 sps:$4 sm:$0xff]   ;;  %v2067_v41 = vld [vmem:[%s3449_s0 + $0xf8] ss:$12 sps:$4 sm:$0xff]  }
   0xe   :  { %723 = vmatpush1.bf16.msra.mxu1 %v2010_v5  ;;  %v2044_v39 = vld [vmem:[%s3449_s0 + $0x60] ss:$12 sps:$4 sm:$0xff]   ;;  %v2048_v42 = vld [vmem:[%s3449_s0 + $0x78] ss:$12 sps:$4 sm:$0xff]   ;;  %v2071_v44 = vld [vmem:[%s3449_s0 + $0x110] ss:$12 sps:$4 sm:$0xff]  }
   0xf   :  { %724 = vmatprep.subr.bf16.mxu1 %v2126_v0  ;;  %v2049_v43 = vld [vmem:[%s3449_s0 + $0x94] ss:$12 sps:$4 sm:$0xff]   ;;  %v2052_v45 = vld [vmem:[%s3449_s0 + $0x90] ss:$12 sps:$4 sm:$0xff]   ;;  %v2053_v46 = vld [vmem:[%s3449_s0 + $0xac] ss:$12 sps:$4 sm:$0xff]  }
  0x10   :  { %v2075_v47 = vld [vmem:[%s3449_s0 + $0x128] ss:$12 sps:$4 sm:$0xff]   ;;  %v2057_v49 = vld [vmem:[%s3449_s0 + $0xc4] ss:$12 sps:$4 sm:$0xff]   ;;  %v2079_v50 = vld [vmem:[%s3449_s0 + $0x140] ss:$12 sps:$4 sm:$0xff]  }
  0x11   :  { %v2056_v48 = vld [vmem:[%s3449_s0 + $0xa8] ss:$12 sps:$4 sm:$0xff]   ;;  %v2060_v51 = vld [vmem:[%s3449_s0 + $0xc0] ss:$12 sps:$4 sm:$0xff]   ;;  %v2083_v53 = vld [vmem:[%s3449_s0 + $0x158] ss:$12 sps:$4 sm:$0xff]  }
  0x12   :  { %725 = vmatpush1.bf16.msra.mxu1 %v2011_v6  ;;  %v2061_v52 = vld [vmem:[%s3449_s0 + $0xdc] ss:$12 sps:$4 sm:$0xff]   ;;  %v2064_v54 = vld [vmem:[%s3449_s0 + $0xd8] ss:$12 sps:$4 sm:$0xff]   ;;  %v2065_v55 = vld [vmem:[%s3449_s0 + $0xf4] ss:$12 sps:$4 sm:$0xff]  }
  0x13   :  { %726 = vmatprep.subr.bf16.mxu1 %v2126_v0  ;;  %1811 = vmatmul.mubr.msk.bf16.gmra.mrb[4].mxu0 %vm640_vm1, %v2031_v14  ;;  %v2087_v56 = vld [vmem:[%s3449_s0 + $0x170] ss:$12 sps:$4 sm:$0xff]   ;;  %v2069_v58 = vld [vmem:[%s3449_s0 + $0x10c] ss:$12 sps:$4 sm:$0xff]   ;;  %v2091_v59 = vld [vmem:[%s3449_s0 + $0x188] ss:$12 sps:$4 sm:$0xff]  }
  0x14   :  { %1814 = vmatprep.mubr.msk.bf16.mxu0 %vm2128_vm0, %v2127_v2  ;;  %v2068_v57 = vld [vmem:[%s3449_s0 + $0xf0] ss:$12 sps:$4 sm:$0xff]   ;;  %v2072_v60 = vld [vmem:[%s3449_s0 + $0x108] ss:$12 sps:$4 sm:$0xff]   ;;  %v2095_v62 = vld [vmem:[%s3449_s0 + $0x1a0] ss:$12 sps:$4 sm:$0xff]  }
  0x15   :  { %v2073_v61 = vld [vmem:[%s3449_s0 + $0x124] ss:$12 sps:$4 sm:$0xff]   ;;  %v2076_v63 = vld [vmem:[%s3449_s0 + $0x120] ss:$12 sps:$4 sm:$0xff]   ;;  %v2107_v8 = vld [vmem:[%s3449_s0 + $0x1e8] ss:$12 sps:$4 sm:$0xff]  }
  0x16   :  { %727 = vmatpush1.bf16.msra.mxu1 %v2012_v9  ;;  %v2099_v1 = vld [vmem:[%s3449_s0 + $0x1b8] ss:$12 sps:$4 sm:$0xff]   ;;  %v2081_v4 = vld [vmem:[%s3449_s0 + $0x154] ss:$12 sps:$4 sm:$0xff]   ;;  %v2103_v5 = vld [vmem:[%s3449_s0 + $0x1d0] ss:$12 sps:$4 sm:$0xff]  }
  0x17   :  { %728 = vmatprep.subr.bf16.mxu1 %v2126_v0  ;;  %v2080_v3 = vld [vmem:[%s3449_s0 + $0x138] ss:$12 sps:$4 sm:$0xff]   ;;  %v2084_v6 = vld [vmem:[%s3449_s0 + $0x150] ss:$12 sps:$4 sm:$0xff]   ;;  %v2088_v9 = vld [vmem:[%s3449_s0 + $0x168] ss:$12 sps:$4 sm:$0xff]  }
  0x18   :  { %v2085_v7 = vld [vmem:[%s3449_s0 + $0x16c] ss:$12 sps:$4 sm:$0xff]   ;;  %v2089_v10 = vld [vmem:[%s3449_s0 + $0x184] ss:$12 sps:$4 sm:$0xff]  }
  0x19   :  { %v2111_v11 = vld [vmem:[%s3449_s0 + $0x200] ss:$12 sps:$4 sm:$0xff]   ;;  %v2115_v14 = vld [vmem:[%s3449_s0 + $0x218] ss:$12 sps:$4 sm:$0xff]  }
  0x1a   :  { %729 = vmatpush1.bf16.msra.mxu1 %v2013_v12  ;;  %v2092_v12 = vld [vmem:[%s3449_s0 + $0x180] ss:$12 sps:$4 sm:$0xff]  }
  0x1b   :  { %730 = vmatprep.subr.bf16.mxu1 %v2126_v0  ;;  %1815 = vmatmul.mubr.msk.bf16.gmra.mrb[8].mxu0 %vm640_vm1, %v2035_v17  ;;  %v2119_v17 = vld [vmem:[%s3449_s0 + $0x230] ss:$12 sps:$4 sm:$0xff]  }
  0x1c   :  { %1818 = vmatprep.mubr.msk.bf16.mxu0 %vm2128_vm0, %v2127_v2 }
  0x1e   :  { %731 = vmatpush1.bf16.msra.mxu1 %v2014_v13  ;;  %v2093_v13 = vld [vmem:[%s3449_s0 + $0x19c] ss:$12 sps:$4 sm:$0xff]  }
  0x1f   :  { %732 = vmatprep.subr.bf16.mxu1 %v2126_v0 }
  0x22   :  { %733 = vmatpush1.bf16.msra.mxu1 %v2015_v15  ;;  %v2096_v15 = vld [vmem:[%s3449_s0 + $0x198] ss:$12 sps:$4 sm:$0xff]  }
  0x23   :  { %734 = vmatprep.subr.bf16.mxu1 %v2126_v0  ;;  %1819 = vmatmul.mubr.msk.bf16.gmra.mrb[12].mxu0 %vm640_vm1, %v2039_v20  ;;  %v2122_v20 = vld [vmem:[%s3449_s0 + $0x248] ss:$0 sps:$4 sm:$0xff]  }
  0x24   :  { %1822 = vmatprep.mubr.msk.bf16.mxu0 %vm2128_vm0, %v2127_v2 }
  0x26   :  { %735 = vmatpush1.bf16.msra.mxu1 %v2016_v16  ;;  %v2097_v16 = vld [vmem:[%s3449_s0 + $0x1b4] ss:$12 sps:$4 sm:$0xff]  }
  0x27   :  { %736 = vmatprep.subr.bf16.mxu1 %v2126_v0 }
  0x2a   :  { %737 = vmatpush1.bf16.msra.mxu1 %v2017_v18  ;;  %v2100_v18 = vld [vmem:[%s3449_s0 + $0x1b0] ss:$12 sps:$4 sm:$0xff]  }
  0x2b   :  { %738 = vmatprep.subr.bf16.mxu1 %v2126_v0  ;;  %1823 = vmatmul.mubr.msk.bf16.gmra.mrb[16].mxu0 %vm640_vm1, %v2043_v23  ;;  %v2109_v23 = vld [vmem:[%s3449_s0 + $0x1fc] ss:$12 sps:$4 sm:$0xff]  }
  0x2c   :  { %1826 = vmatprep.mubr.msk.bf16.mxu0 %vm2128_vm0, %v2127_v2 }
  0x2e   :  { %739 = vmatpush1.bf16.msra.mxu1 %v2018_v19  ;;  %v2101_v19 = vld [vmem:[%s3449_s0 + $0x1cc] ss:$12 sps:$4 sm:$0xff]  }
  0x2f   :  { %740 = vmatprep.subr.bf16.mxu1 %v2126_v0 }
  0x32   :  { %741 = vmatpush1.bf16.msra.mxu1 %v2019_v21  ;;  %v2104_v21 = vld [vmem:[%s3449_s0 + $0x1c8] ss:$12 sps:$4 sm:$0xff]  }
  0x33   :  { %742 = vmatprep.subr.bf16.mxu1 %v2126_v0  ;;  %1827 = vmatmul.mubr.msk.bf16.gmra.mrb[20].mxu0 %vm640_vm1, %v2047_v26 }
  0x34   :  { %1830 = vmatprep.mubr.msk.bf16.mxu0 %vm2128_vm0, %v2127_v2 }
  0x36   :  { %743 = vmatpush1.bf16.msra.mxu1 %v2020_v22  ;;  %v2105_v22 = vld [vmem:[%s3449_s0 + $0x1e4] ss:$12 sps:$4 sm:$0xff]  }
  0x37   :  { %744 = vmatprep.subr.bf16.mxu1 %v2126_v0 }
  0x3a   :  { %745 = vmatpush1.bf16.msra.mxu1 %v2022_v24  ;;  %v2112_v24 = vld [vmem:[%s3449_s0 + $0x1f8] ss:$12 sps:$4 sm:$0xff]  }
  0x3b   :  { %746 = vmatprep.subr.bf16.mxu1 %v2126_v0  ;;  %1831 = vmatmul.mubr.msk.bf16.gmra.mrb[24].mxu0 %vm640_vm1, %v2051_v29  ;;  %v2077_v0 = vld [vmem:[%s3449_s0 + $0x13c] ss:$12 sps:$4 sm:$0xff]  }
  0x3c   :  { %1834 = vmatprep.mubr.msk.bf16.mxu0 %vm2128_vm0, %v2127_v2  ;;  %v2116_v29 = vld [vmem:[%s3449_s0 + $0x210] ss:$12 sps:$4 sm:$0xff]  }
  0x3e   :  { %747 = vmatpush1.bf16.msra.mxu1 %v2024_v25  ;;  %v2113_v25 = vld [vmem:[%s3449_s0 + $0x214] ss:$12 sps:$4 sm:$0xff]  }
  0x41   :  { %749 = vmatmul.mubr.bf16.vlgmr.msra.gmra.mrb[0].mxu1 %v2025_v27 }
  0x42   :  { %756 = vmatprep.mubr.bf16.mxu1 %v2029_v28 }
  0x43   :  { %1835 = vmatmul.mubr.msk.bf16.gmra.mrb[28].mxu0 %vm640_vm1, %v2055_v32 }
  0x44   :  { %1838 = vmatprep.mubr.msk.bf16.mxu0 %vm2128_vm0, %v2127_v2 }
  0x49   :  { %757 = vmatmul.mubr.bf16.gmra.mrb[4].mxu1 %v2032_v30 }
  0x4a   :  { %764 = vmatprep.mubr.bf16.mxu1 %v2033_v31  ;;  %v2117_v31 = vld [vmem:[%s3449_s0 + $0x22c] ss:$12 sps:$4 sm:$0xff]  }
  0x4b   :  { %1839 = vmatmul.mubr.msk.bf16.gmra.mrb[32].mxu0 %vm640_vm1, %v2059_v35 }
  0x4c   :  { %1842 = vmatprep.mubr.msk.bf16.mxu0 %vm2128_vm0, %v2127_v2 }
  0x51   :  { %765 = vmatmul.mubr.bf16.gmra.mrb[8].mxu1 %v2036_v33  ;;  %v117_v33 = vld [vmem:[%s3449_s0 + $0x240] sm:$0xff] }
  0x52   :  { %772 = vmatprep.mubr.bf16.mxu1 %v2037_v34 }
  0x53   :  { %1843 = vmatmul.mubr.msk.bf16.gmra.mrb[36].mxu0 %vm640_vm1, %v2063_v38  ;;  %v1728_v38 = vcombine.high %v117_v33, %v117_v33 }
  0x54   :  { %1846 = vmatprep.mubr.msk.bf16.mxu0 %vm2128_vm0, %v2127_v2 }
  0x59   :  { %773 = vmatmul.mubr.bf16.gmra.mrb[12].mxu1 %v2040_v36  ;;  %v2120_v36 = vld [vmem:[%s3449_s0 + $0x228] ss:$12 sps:$4 sm:$0xff]  }
  0x5a   :  { %780 = vmatprep.mubr.bf16.mxu1 %v2041_v37 }
  0x5b   :  { %1847 = vmatmul.mubr.msk.bf16.gmra.mrb[40].mxu0 %vm640_vm1, %v2067_v41 }
  0x5c   :  { %1850 = vmatprep.mubr.msk.bf16.mxu0 %vm2128_vm0, %v2127_v2 }
  0x61   :  { %781 = vmatmul.mubr.bf16.gmra.mrb[16].mxu1 %v2044_v39 }
  0x62   :  { %788 = vmatprep.mubr.bf16.mxu1 %v2045_v40 }
  0x63   :  { %1851 = vmatmul.mubr.msk.bf16.gmra.mrb[44].mxu0 %vm640_vm1, %v2071_v44 }
  0x64   :  { %1854 = vmatprep.mubr.msk.bf16.mxu0 %vm2128_vm0, %v2127_v2 }
  0x69   :  { %789 = vmatmul.mubr.bf16.gmra.mrb[20].mxu1 %v2048_v42  ;;  %v1727_v42 = vcombine.low %v117_v33, %v117_v33 }
  0x6a   :  { %796 = vmatprep.mubr.bf16.mxu1 %v2049_v43 }
  0x6b   :  { %1855 = vmatmul.mubr.msk.bf16.gmra.mrb[48].mxu0 %vm640_vm1, %v2075_v47 }
  0x6c   :  { %1858 = vmatprep.mubr.msk.bf16.mxu0 %vm2128_vm0, %v2127_v2 }
  0x71   :  { %797 = vmatmul.mubr.bf16.gmra.mrb[24].mxu1 %v2052_v45 }
  0x72   :  { %804 = vmatprep.mubr.bf16.mxu1 %v2053_v46 }
  0x73   :  { %1859 = vmatmul.mubr.msk.bf16.gmra.mrb[52].mxu0 %vm640_vm1, %v2079_v50 }
  0x74   :  { %1862 = vmatprep.mubr.msk.bf16.mxu0 %vm2128_vm0, %v2127_v2 }
  0x79   :  { %805 = vmatmul.mubr.bf16.gmra.mrb[28].mxu1 %v2056_v48 }
  0x7a   :  { %812 = vmatprep.mubr.bf16.mxu1 %v2057_v49 }
  0x7b   :  { %1863 = vmatmul.mubr.msk.bf16.gmra.mrb[56].mxu0 %vm640_vm1, %v2083_v53 }
  0x7c   :  { %1866 = vmatprep.mubr.msk.bf16.mxu0 %vm2128_vm0, %v2127_v2 }
  0x81   :  { %813 = vmatmul.mubr.bf16.gmra.mrb[32].mxu1 %v2060_v51 }
  0x82   :  { %820 = vmatprep.mubr.bf16.mxu1 %v2061_v52  ;;  %v2533_v52 = vld [vmem:[%s3450_s2] ss:$0 sm:$0xff] }
  0x83   :  { %1867 = vmatmul.mubr.msk.bf16.gmra.mrb[60].mxu0 %vm640_vm1, %v2087_v56 }
  0x84   :  { %1870 = vmatprep.mubr.msk.bf16.mxu0 %vm2128_vm0, %v2127_v2 }
  0x89   :  { %821 = vmatmul.mubr.bf16.gmra.mrb[36].mxu1 %v2064_v54 }
  0x8a   :  { %828 = vmatprep.mubr.bf16.mxu1 %v2065_v55 }
  0x8b   :  { %1871 = vmatmul.mubr.msk.bf16.gmra.mrb[64].mxu0 %vm640_vm1, %v2091_v59 }
  0x8c   :  { %1874 = vmatprep.mubr.msk.bf16.mxu0 %vm2128_vm0, %v2127_v2 }
  0x91   :  { %829 = vmatmul.mubr.bf16.gmra.mrb[40].mxu1 %v2068_v57 }
  0x92   :  { %836 = vmatprep.mubr.bf16.mxu1 %v2069_v58 }
  0x93   :  { %1875 = vmatmul.mubr.msk.bf16.gmra.mrb[68].mxu0 %vm640_vm1, %v2095_v62 }
  0x94   :  { %1878 = vmatprep.mubr.msk.bf16.mxu0 %vm2128_vm0, %v2127_v2 }
  0x99   :  { %837 = vmatmul.mubr.bf16.gmra.mrb[44].mxu1 %v2072_v60 }
  0x9a   :  { %844 = vmatprep.mubr.bf16.mxu1 %v2073_v61 }
  0x9b   :  { %1879 = vmatmul.mubr.msk.bf16.gmra.mrb[72].mxu0 %vm640_vm1, %v2099_v1 }
  0x9c   :  { %1882 = vmatprep.mubr.msk.bf16.mxu0 %vm2128_vm0, %v2127_v2 }
  0xa1   :  { %845 = vmatmul.mubr.bf16.gmra.mrb[48].mxu1 %v2076_v63 }
  0xa2   :  { %852 = vmatprep.mubr.bf16.mxu1 %v2077_v0 }
  0xa3   :  { %1883 = vmatmul.mubr.msk.bf16.gmra.mrb[76].mxu0 %vm640_vm1, %v2103_v5 }
  0xa4   :  { %1886 = vmatprep.mubr.msk.bf16.mxu0 %vm2128_vm0, %v2127_v2 }
  0xa9   :  { %853 = vmatmul.mubr.bf16.gmra.mrb[52].mxu1 %v2080_v3 }
  0xaa   :  { %860 = vmatprep.mubr.bf16.mxu1 %v2081_v4 }
  0xab   :  { %1887 = vmatmul.mubr.msk.bf16.gmra.mrb[80].mxu0 %vm640_vm1, %v2107_v8 }
  0xac   :  { %1890 = vmatprep.mubr.msk.bf16.mxu0 %vm2128_vm0, %v2127_v2 }
  0xb1   :  { %861 = vmatmul.mubr.bf16.gmra.mrb[56].mxu1 %v2084_v6 }
  0xb2   :  { %868 = vmatprep.mubr.bf16.mxu1 %v2085_v7 }
  0xb3   :  { %1891 = vmatmul.mubr.msk.bf16.gmra.mrb[84].mxu0 %vm640_vm1, %v2111_v11 }
  0xb4   :  { %1894 = vmatprep.mubr.msk.bf16.mxu0 %vm2128_vm0, %v2127_v2 }
  0xb9   :  { %869 = vmatmul.mubr.bf16.gmra.mrb[60].mxu1 %v2088_v9 }
  0xba   :  { %876 = vmatprep.mubr.bf16.mxu1 %v2089_v10 }
  0xbb   :  { %1895 = vmatmul.mubr.msk.bf16.gmra.mrb[88].mxu0 %vm640_vm1, %v2115_v14 }
  0xbc   :  { %1898 = vmatprep.mubr.msk.bf16.mxu0 %vm2128_vm0, %v2127_v2 }
  0xc1   :  { %877 = vmatmul.mubr.bf16.gmra.mrb[64].mxu1 %v2092_v12 }
  0xc2   :  { %884 = vmatprep.mubr.bf16.mxu1 %v2093_v13 }
  0xc3   :  { %1899 = vmatmul.mubr.msk.bf16.gmra.mrb[92].mxu0 %vm640_vm1, %v2119_v17 }
  0xc4   :  { %1902 = vmatprep.mubr.msk.bf16.mxu0 %vm2128_vm0, %v2127_v2  ;;  %v2108_v2 = vld [vmem:[%s3449_s0 + $0x1e0] ss:$12 sps:$4 sm:$0xff]  }
  0xc9   :  { %885 = vmatmul.mubr.bf16.gmra.mrb[68].mxu1 %v2096_v15 }
  0xca   :  { %892 = vmatprep.mubr.bf16.mxu1 %v2097_v16 }
  0xcb   :  { %1903 = vmatmul.mubr.msk.bf16.gmra.mrb[96].mxu0 %vm640_vm1, %v2122_v20 }
  0xd1   :  { %893 = vmatmul.mubr.bf16.gmra.mrb[72].mxu1 %v2100_v18 }
  0xd2   :  { %900 = vmatprep.mubr.bf16.mxu1 %v2101_v19 }
  0xd9   :  { %901 = vmatmul.mubr.bf16.gmra.mrb[76].mxu1 %v2104_v21 }
  0xda   :  { %908 = vmatprep.mubr.bf16.mxu1 %v2105_v22 }
  0xde   :  { %v982_v26 = vpop.f32.mrb[0].mxu0 }
  0xdf   :  { %v1808_v27 = vpop.f32.mrb[1].mxu0 }
  0xe0   :  { %v985_v28 = vpop.f32.mrb[2].mxu0 }
  0xe1   :  { %909 = vmatmul.mubr.bf16.gmra.mrb[80].mxu1 %v2108_v2  ;;  %v1809_v30 = vpop.f32.mrb[3].mxu0 }
  0xe2   :  { %916 = vmatprep.mubr.bf16.mxu1 %v2109_v23 }
  0xe6   :  { %v990_v32 = vpop.f32.mrb[4].mxu0 }
  0xe7   :  { %v1812_v34 = vpop.f32.mrb[5].mxu0 }
  0xe8   :  { %v993_v35 = vpop.f32.mrb[6].mxu0 }
  0xe9   :  { %917 = vmatmul.mubr.bf16.gmra.mrb[84].mxu1 %v2112_v24  ;;  %v1813_v37 = vpop.f32.mrb[7].mxu0 }
  0xea   :  { %924 = vmatprep.mubr.bf16.mxu1 %v2113_v25 }
  0xee   :  { %v998_v39 = vpop.f32.mrb[8].mxu0 }
  0xef   :  { %v1816_v40 = vpop.f32.mrb[9].mxu0 }
  0xf0   :  { %v1001_v41 = vpop.f32.mrb[10].mxu0 }
  0xf1   :  { %925 = vmatmul.mubr.bf16.gmra.mrb[88].mxu1 %v2116_v29  ;;  %v1817_v43 = vpop.f32.mrb[11].mxu0 }
  0xf2   :  { %932 = vmatprep.mubr.bf16.mxu1 %v2117_v31 }
  0xf6   :  { %v1006_v44 = vpop.f32.mrb[12].mxu0 }
  0xf7   :  { %v1820_v45 = vpop.f32.mrb[13].mxu0 }
  0xf8   :  { %v1009_v46 = vpop.f32.mrb[14].mxu0 }
  0xf9   :  { %933 = vmatmul.mubr.bf16.gmra.mrb[92].mxu1 %v2120_v36  ;;  %v1821_v47 = vpop.f32.mrb[15].mxu0 }
  0xfa   :  { %940 = vmatprep.mubr.bf16.mxu1 %v1728_v38 }
  0xfe   :  { %v1014_v48 = vpop.f32.mrb[16].mxu0 }
  0xff   :  { %v1824_v49 = vpop.f32.mrb[17].mxu0 }
 0x100   :  { %v2528_v50 = vpop.f32.mrb[18].mxu0 }
 0x101   :  { %941 = vmatmul.mubr.bf16.gmra.mrb[96].mxu1 %v1727_v42  ;;  %v1825_v51 = vpop.f32.mrb[19].mxu0 }
 0x106   :  { %v2535_v53 = vpop.f32.mrb[20].mxu0 }
 0x107   :  { %v1828_v54 = vpop.f32.mrb[21].mxu0 }
 0x108   :  { %v2537_v56 = vpop.f32.mrb[22].mxu0 }
 0x109   :  { %v1829_v59 = vpop.f32.mrb[23].mxu0 }
 0x10e   :  { %v2545_v1 = vpop.f32.mrb[24].mxu0 }
 0x10f   :  { %v1832_v3 = vpop.f32.mrb[25].mxu0 }
 0x110   :  { %v2547_v5 = vpop.f32.mrb[26].mxu0 }
 0x111   :  { %v1833_v8 = vpop.f32.mrb[27].mxu0 }
 0x114   :  { %v750_v55 = vpop.f32.mrb[0].mxu1 }
 0x115   :  { %v751_v57 = vadd.f32 %v2533_v52, %v750_v55  ;;  %v752_v58 = vpop.f32.mrb[1].mxu1 }
 0x116   :  { %v753_v60 = vpop.f32.mrb[2].mxu1  ;;  %v2555_v14 = vpop.f32.mrb[28].mxu0 }
 0x117   :  { %v2540_v61 = vadd.f32 %v982_v26, %v751_v57  ;;  %v754_v62 = vadd.f32 %v2533_v52, %v753_v60  ;;  %v755_v63 = vpop.f32.mrb[3].mxu1  ;;  %v1836_v15 = vpop.f32.mrb[29].mxu0 }
 0x118   :  { %v2557_v17 = vpop.f32.mrb[30].mxu0 }
 0x119   :  { %v2543_v0 = vadd.f32 %v985_v28, %v754_v62  ;;  %v1837_v20 = vpop.f32.mrb[31].mxu0 }
 0x11c   :  { %v758_v4 = vpop.f32.mrb[4].mxu1 }
 0x11d   :  { %v759_v6 = vadd.f32 %v2533_v52, %v758_v4  ;;  %v760_v7 = vpop.f32.mrb[5].mxu1 }
 0x11e   :  { %v761_v9 = vpop.f32.mrb[6].mxu1  ;;  %v2565_v25 = vpop.f32.mrb[32].mxu0 }
 0x11f   :  { %v2550_v10 = vadd.f32 %v990_v32, %v759_v6  ;;  %v762_v11 = vadd.f32 %v2533_v52, %v761_v9  ;;  %v763_v12 = vpop.f32.mrb[7].mxu1  ;;  %v1840_v26 = vpop.f32.mrb[33].mxu0  ;;  %v1180_v9 = vadd.f32 %v2543_v0, %v2540_v61 }
 0x120   :  { %v2567_v28 = vpop.f32.mrb[34].mxu0 }
 0x121   :  { %v2553_v13 = vadd.f32 %v993_v35, %v762_v11  ;;  %v1841_v31 = vpop.f32.mrb[35].mxu0 }
 0x124   :  { %v766_v16 = vpop.f32.mrb[8].mxu1 }
 0x125   :  { %v767_v18 = vadd.f32 %v2533_v52, %v766_v16  ;;  %v768_v19 = vpop.f32.mrb[9].mxu1  ;;  %v1181_v16 = vadd.f32 %v1180_v9, %v2550_v10 }
 0x126   :  { %v769_v21 = vpop.f32.mrb[10].mxu1  ;;  %v2575_v37 = vpop.f32.mrb[36].mxu0 }
 0x127   :  { %v2560_v22 = vadd.f32 %v998_v39, %v767_v18  ;;  %v770_v2 = vadd.f32 %v2533_v52, %v769_v21  ;;  %v771_v23 = vpop.f32.mrb[11].mxu1  ;;  %v1844_v38 = vpop.f32.mrb[37].mxu0 }
 0x128   :  { %v2577_v40 = vpop.f32.mrb[38].mxu0 }
 0x129   :  { %v2563_v24 = vadd.f32 %v1001_v41, %v770_v2  ;;  %v1845_v43 = vpop.f32.mrb[39].mxu0  ;;  %v1182_v2 = vadd.f32 %v1181_v16, %v2553_v13 }
 0x12c   :  { %v774_v27 = vpop.f32.mrb[12].mxu1 }
 0x12d   :  { %v775_v29 = vadd.f32 %v2533_v52, %v774_v27  ;;  %v776_v30 = vpop.f32.mrb[13].mxu1 }
 0x12e   :  { %v777_v32 = vpop.f32.mrb[14].mxu1 }
 0x12f   :  { %v2570_v33 = vadd.f32 %v1006_v44, %v775_v29  ;;  %v778_v34 = vadd.f32 %v2533_v52, %v777_v32  ;;  %v779_v35 = vpop.f32.mrb[15].mxu1  ;;  %v1183_v29 = vadd.f32 %v1182_v2, %v2560_v22 }
 0x131   :  { %v2573_v36 = vadd.f32 %v1009_v46, %v778_v34  ;;  %v2586_v46 = vpop.f32.mrb[40].mxu0  ;;  %v1184_v38 = vadd.f32 %v1183_v29, %v2563_v24 }
 0x132   :  { %v1848_v54 = vpop.f32.mrb[41].mxu0 }
 0x133   :  { %v2588_v57 = vpop.f32.mrb[42].mxu0 }
 0x134   :  { %v782_v39 = vpop.f32.mrb[16].mxu1  ;;  %v1849_v60 = vpop.f32.mrb[43].mxu0 }
 0x135   :  { %v783_v41 = vadd.f32 %v2533_v52, %v782_v39  ;;  %v784_v42 = vpop.f32.mrb[17].mxu1 }
 0x136   :  { %v785_v45 = vpop.f32.mrb[18].mxu1  ;;  %v2598_v4 = vpop.f32.mrb[44].mxu0  ;;  %v1185_v42 = vadd.f32 %v1184_v38, %v2570_v33 }
 0x137   :  { %v2580_v47 = vadd.f32 %v1014_v48, %v783_v41  ;;  %v786_v44 = vadd.f32 %v2533_v52, %v785_v45  ;;  %v787_v49 = vpop.f32.mrb[19].mxu1  ;;  %v1852_v6 = vpop.f32.mrb[45].mxu0 }
 0x138   :  { %v2600_v8 = vpop.f32.mrb[46].mxu0 }
 0x139   :  { %v2584_v51 = vadd.f32 %v2528_v50, %v786_v44 }
 0x13c   :  { %v790_v55 = vpop.f32.mrb[20].mxu1 }
 0x13d   :  { %v791_v58 = vadd.f32 %v2533_v52, %v790_v55  ;;  %v792_v59 = vpop.f32.mrb[21].mxu1 }
 0x13e   :  { %v793_v62 = vpop.f32.mrb[22].mxu1 }
 0x13f   :  { %v2592_v48 = vadd.f32 %v2535_v53, %v791_v58  ;;  %v794_v63 = vadd.f32 %v2533_v52, %v793_v62  ;;  %v795_v3 = vpop.f32.mrb[23].mxu1  ;;  %v1853_v53 = vpop.f32.mrb[47].mxu0  ;;  %v1186_v58 = vadd.f32 %v1185_v42, %v2573_v36 }
 0x140   :  { %v2613_v21 = vpop.f32.mrb[48].mxu0 }
 0x141   :  { %v2596_v50 = vadd.f32 %v2537_v56, %v794_v63  ;;  %v1856_v23 = vpop.f32.mrb[49].mxu0  ;;  %v1187_v62 = vadd.f32 %v1186_v58, %v2580_v47 }
 0x142   :  { %v2616_v27 = vpop.f32.mrb[50].mxu0 }
 0x143   :  { %v1857_v31 = vpop.f32.mrb[51].mxu0 }
 0x144   :  { %v798_v7 = vpop.f32.mrb[24].mxu1 }
 0x145   :  { %v799_v11 = vadd.f32 %v2533_v52, %v798_v7  ;;  %v800_v12 = vpop.f32.mrb[25].mxu1 }
 0x146   :  { %v801_v15 = vpop.f32.mrb[26].mxu1  ;;  %v2628_v41 = vpop.f32.mrb[52].mxu0 }
 0x147   :  { %v2607_v18 = vadd.f32 %v2545_v1, %v799_v11  ;;  %v802_v56 = vadd.f32 %v2533_v52, %v801_v15  ;;  %v803_v19 = vpop.f32.mrb[27].mxu1  ;;  %v1860_v43 = vpop.f32.mrb[53].mxu0  ;;  %v1188_v11 = vadd.f32 %v1187_v62, %v2584_v51 }
 0x148   :  { %v2631_v44 = vpop.f32.mrb[54].mxu0 }
 0x149   :  { %v2611_v20 = vadd.f32 %v2547_v5, %v802_v56  ;;  %v1861_v54 = vpop.f32.mrb[55].mxu0  ;;  %v1189_v16 = vadd.f32 %v1188_v11, %v2592_v48 }
 0x14c   :  { %v806_v26 = vpop.f32.mrb[28].mxu1 }
 0x14d   :  { %v807_v30 = vadd.f32 %v2533_v52, %v806_v26  ;;  %v808_v1 = vpop.f32.mrb[29].mxu1  ;;  %v1190_v26 = vadd.f32 %v1189_v16, %v2596_v50 }
 0x14e   :  { %v809_v32 = vpop.f32.mrb[30].mxu1  ;;  %v2643_v3 = vpop.f32.mrb[56].mxu0 }
 0x14f   :  { %v2621_v34 = vadd.f32 %v2555_v14, %v807_v30  ;;  %v810_v5 = vadd.f32 %v2533_v52, %v809_v32  ;;  %v811_v35 = vpop.f32.mrb[31].mxu1  ;;  %v1864_v6 = vpop.f32.mrb[57].mxu0  ;;  %v1191_v31 = vadd.f32 %v1190_v26, %v2607_v18 }
 0x150   :  { %v2645_v9 = vpop.f32.mrb[58].mxu0 }
 0x151   :  { %v2626_v39 = vadd.f32 %v2557_v17, %v810_v5  ;;  %v1865_v53 = vpop.f32.mrb[59].mxu0  ;;  %v1192_v43 = vadd.f32 %v1191_v31, %v2611_v20 }
 0x154   :  { %v814_v45 = vpop.f32.mrb[32].mxu1 }
 0x155   :  { %v815_v49 = vadd.f32 %v2533_v52, %v814_v45  ;;  %v816_v14 = vpop.f32.mrb[33].mxu1 }
 0x156   :  { %v817_v55 = vpop.f32.mrb[34].mxu1  ;;  %v2657_v23 = vpop.f32.mrb[60].mxu0  ;;  %v1193_v14 = vadd.f32 %v1192_v43, %v2621_v34 }
 0x157   :  { %v2636_v59 = vadd.f32 %v2565_v25, %v815_v49  ;;  %v818_v17 = vadd.f32 %v2533_v52, %v817_v55  ;;  %v819_v60 = vpop.f32.mrb[35].mxu1  ;;  %v1868_v29 = vpop.f32.mrb[61].mxu0 }
 0x158   :  { %v2660_v1 = vpop.f32.mrb[62].mxu0  ;;  %v1194_v6 = vadd.f32 %v1193_v14, %v2626_v39 }
 0x159   :  { %v2641_v63 = vadd.f32 %v2567_v28, %v818_v17  ;;  %v1869_v5 = vpop.f32.mrb[63].mxu0 }
 0x15c   :  { %v822_v7 = vpop.f32.mrb[36].mxu1 }
 0x15d   :  { %v823_v12 = vadd.f32 %v2533_v52, %v822_v7  ;;  %v824_v25 = vpop.f32.mrb[37].mxu1 }
 0x15e   :  { %v825_v15 = vpop.f32.mrb[38].mxu1  ;;  %v2672_v49 = vpop.f32.mrb[64].mxu0 }
 0x15f   :  { %v2651_v56 = vadd.f32 %v2575_v37, %v823_v12  ;;  %v826_v28 = vadd.f32 %v2533_v52, %v825_v15  ;;  %v827_v19 = vpop.f32.mrb[39].mxu1  ;;  %v1872_v54 = vpop.f32.mrb[65].mxu0  ;;  %v1195_v12 = vadd.f32 %v1194_v6, %v2636_v59 }
 0x160   :  { %v2675_v58 = vpop.f32.mrb[66].mxu0 }
 0x161   :  { %v2655_v2 = vadd.f32 %v2577_v40, %v826_v28  ;;  %v1873_v60 = vpop.f32.mrb[67].mxu0  ;;  %v1196_v19 = vadd.f32 %v1195_v12, %v2641_v63 }
 0x163   :  { %v1197_v31 = vadd.f32 %v1196_v19, %v2651_v56 }
 0x164   :  { %v830_v30 = vpop.f32.mrb[40].mxu1 }
 0x165   :  { %v831_v32 = vadd.f32 %v2533_v52, %v830_v30  ;;  %v832_v37 = vpop.f32.mrb[41].mxu1 }
 0x166   :  { %v833_v35 = vpop.f32.mrb[42].mxu1  ;;  %v2687_v53 = vpop.f32.mrb[68].mxu0 }
 0x167   :  { %v2665_v38 = vadd.f32 %v2586_v46, %v831_v32  ;;  %v834_v40 = vadd.f32 %v2533_v52, %v833_v35  ;;  %v835_v42 = vpop.f32.mrb[43].mxu1  ;;  %v1876_v15 = vpop.f32.mrb[69].mxu0 }
 0x168   :  { %v2689_v28 = vpop.f32.mrb[70].mxu0 }
 0x169   :  { %v2670_v45 = vadd.f32 %v2588_v57, %v834_v40  ;;  %v1877_v29 = vpop.f32.mrb[71].mxu0  ;;  %v1198_v40 = vadd.f32 %v1197_v31, %v2655_v2 }
 0x16b   :  { %v1199_v54 = vadd.f32 %v1198_v40, %v2665_v38 }
 0x16c   :  { %v838_v55 = vpop.f32.mrb[44].mxu1 }
 0x16d   :  { %v839_v17 = vadd.f32 %v2533_v52, %v838_v55  ;;  %v840_v46 = vpop.f32.mrb[45].mxu1  ;;  %v1200_v6 = vadd.f32 %v1199_v54, %v2670_v45 }
 0x16e   :  { %v841_v62 = vpop.f32.mrb[46].mxu1  ;;  %v2701_v35 = vpop.f32.mrb[72].mxu0 }
 0x16f   :  { %v2680_v7 = vadd.f32 %v2598_v4, %v839_v17  ;;  %v842_v57 = vadd.f32 %v2533_v52, %v841_v62  ;;  %v843_v11 = vpop.f32.mrb[47].mxu1  ;;  %v1880_v42 = vpop.f32.mrb[73].mxu0 }
 0x170   :  { %v2704_v14 = vpop.f32.mrb[74].mxu0 }
 0x171   :  { %v2685_v25 = vadd.f32 %v2600_v8, %v842_v57  ;;  %v1881_v17 = vpop.f32.mrb[75].mxu0  ;;  %v1201_v12 = vadd.f32 %v1200_v6, %v2680_v7 }
 0x174   :  { %v846_v16 = vpop.f32.mrb[48].mxu1 }
 0x175   :  { %v847_v26 = vadd.f32 %v2533_v52, %v846_v16  ;;  %v848_v4 = vpop.f32.mrb[49].mxu1 }
 0x176   :  { %v849_v30 = vpop.f32.mrb[50].mxu1  ;;  %v2716_v11 = vpop.f32.mrb[76].mxu0 }
 0x177   :  { %v2695_v32 = vadd.f32 %v2613_v21, %v847_v26  ;;  %v850_v8 = vadd.f32 %v2533_v52, %v849_v30  ;;  %v851_v37 = vpop.f32.mrb[51].mxu1  ;;  %v1884_v15 = vpop.f32.mrb[77].mxu0  ;;  %v1202_v30 = vadd.f32 %v1201_v12, %v2685_v25 }
 0x178   :  { %v2719_v19 = vpop.f32.mrb[78].mxu0 }
 0x179   :  { %v2699_v5 = vadd.f32 %v2616_v27, %v850_v8  ;;  %v1885_v4 = vpop.f32.mrb[79].mxu0  ;;  %v1203_v37 = vadd.f32 %v1202_v30, %v2695_v32 }
 0x17c   :  { %v854_v43 = vpop.f32.mrb[52].mxu1 }
 0x17d   :  { %v855_v55 = vadd.f32 %v2533_v52, %v854_v43  ;;  %v856_v21 = vpop.f32.mrb[53].mxu1 }
 0x17e   :  { %v857_v46 = vpop.f32.mrb[54].mxu1  ;;  %v2731_v42 = vpop.f32.mrb[80].mxu0  ;;  %v1204_v21 = vadd.f32 %v1203_v37, %v2699_v5 }
 0x17f   :  { %v2709_v60 = vadd.f32 %v2628_v41, %v855_v55  ;;  %v858_v27 = vadd.f32 %v2533_v52, %v857_v46  ;;  %v859_v62 = vpop.f32.mrb[55].mxu1  ;;  %v1888_v43 = vpop.f32.mrb[81].mxu0 }
 0x180   :  { %v2733_v55 = vpop.f32.mrb[82].mxu0 }
 0x181   :  { %v2714_v57 = vadd.f32 %v2631_v44, %v858_v27  ;;  %v1889_v46 = vpop.f32.mrb[83].mxu0  ;;  %v1205_v62 = vadd.f32 %v1204_v21, %v2709_v60 }
 0x184   :  { %v862_v16 = vpop.f32.mrb[56].mxu1 }
 0x185   :  { %v863_v26 = vadd.f32 %v2533_v52, %v862_v16  ;;  %v864_v41 = vpop.f32.mrb[57].mxu1 }
 0x186   :  { %v865_v29 = vpop.f32.mrb[58].mxu1  ;;  %v2745_v16 = vpop.f32.mrb[84].mxu0 }
 0x187   :  { %v2724_v31 = vadd.f32 %v2643_v3, %v863_v26  ;;  %v866_v44 = vadd.f32 %v2533_v52, %v865_v29  ;;  %v867_v8 = vpop.f32.mrb[59].mxu1  ;;  %v1206_v26 = vadd.f32 %v1205_v62, %v2714_v57  ;;  %v1892_v41 = vpop.f32.mrb[85].mxu0 }
 0x188   :  { %v2748_v29 = vpop.f32.mrb[86].mxu0 }
 0x189   :  { %v2729_v40 = vadd.f32 %v2645_v9, %v866_v44  ;;  %v1207_v30 = vadd.f32 %v1206_v26, %v2724_v31  ;;  %v1893_v8 = vpop.f32.mrb[87].mxu0 }
 0x18b   :  { %v1208_v21 = vadd.f32 %v1207_v30, %v2729_v40 }
 0x18c   :  { %v870_v54 = vpop.f32.mrb[60].mxu1 }
 0x18d   :  { %v871_v17 = vadd.f32 %v2533_v52, %v870_v54  ;;  %v872_v3 = vpop.f32.mrb[61].mxu1 }
 0x18e   :  { %v873_v27 = vpop.f32.mrb[62].mxu1  ;;  %v2760_v3 = vpop.f32.mrb[88].mxu0 }
 0x18f   :  { %v2739_v6 = vadd.f32 %v2657_v23, %v871_v17  ;;  %v874_v9 = vadd.f32 %v2533_v52, %v873_v27  ;;  %v875_v12 = vpop.f32.mrb[63].mxu1  ;;  %v1896_v27 = vpop.f32.mrb[89].mxu0 }
 0x191   :  { %v2743_v15 = vadd.f32 %v2660_v1, %v874_v9  ;;  %v1209_v46 = vadd.f32 %v1208_v21, %v2739_v6  ;;  %v2763_v9 = vpop.f32.mrb[90].mxu0 }
 0x192   :  { %v1897_v26 = vpop.f32.mrb[91].mxu0 }
 0x194   :  { %v878_v4 = vpop.f32.mrb[64].mxu1 }
 0x195   :  { %v879_v44 = vadd.f32 %v2533_v52, %v878_v4  ;;  %v880_v23 = vpop.f32.mrb[65].mxu1  ;;  %v1210_v4 = vadd.f32 %v1209_v46, %v2743_v15 }
 0x196   :  { %v881_v37 = vpop.f32.mrb[66].mxu1 }
 0x197   :  { %v2753_v43 = vadd.f32 %v2672_v49, %v879_v44  ;;  %v882_v1 = vadd.f32 %v2533_v52, %v881_v37  ;;  %v883_v54 = vpop.f32.mrb[67].mxu1  ;;  %v2775_v37 = vpop.f32.mrb[92].mxu0 }
 0x199   :  { %v2758_v17 = vadd.f32 %v2675_v58, %v882_v1  ;;  %v1211_v23 = vadd.f32 %v1210_v4, %v2753_v43  ;;  %v1900_v1 = vpop.f32.mrb[93].mxu0 }
 0x19a   :  { %v2777_v21 = vpop.f32.mrb[94].mxu0 }
 0x19b   :  { %3463 = vst [vmem:[#allocation2_spill] sm:$0xff] %v2758_v17  ;;  %v1212_v27 = vadd.f32 %v1211_v23, %v2758_v17 }
 0x19c   :  { %v886_v62 = vpop.f32.mrb[68].mxu1 }
 0x19d   :  { %v887_v12 = vadd.f32 %v2533_v52, %v886_v62  ;;  %v888_v49 = vpop.f32.mrb[69].mxu1  ;;  %v1901_v62 = vpop.f32.mrb[95].mxu0 }
 0x19e   :  { %v889_v41 = vpop.f32.mrb[70].mxu1 }
 0x19f   :  { %v2768_v30 = vadd.f32 %v2687_v53, %v887_v12  ;;  %v890_v58 = vadd.f32 %v2533_v52, %v889_v41  ;;  %v891_v44 = vpop.f32.mrb[71].mxu1 }
 0x1a1   :  { %3464 = vst [vmem:[#allocation3_spill] sm:$0xff] %v2768_v30  ;;  %v2773_v8 = vadd.f32 %v2689_v28, %v890_v58  ;;  %v1213_v49 = vadd.f32 %v1212_v27, %v2768_v30  ;;  %v1174_v58 = vpop.f32.mrb[96].mxu0 }
 0x1a2   :  { %v1904_v23 = vpop.f32.mrb[97].mxu0 }
 0x1a3   :  { %3465 = vst [vmem:[#allocation4_spill] sm:$0xff] %v2773_v8  ;;  %v1214_v44 = vadd.f32 %v1213_v49, %v2773_v8 }
 0x1a4   :  { %v894_v54 = vpop.f32.mrb[72].mxu1 }
 0x1a5   :  { %v895_v46 = vadd.f32 %v2533_v52, %v894_v54  ;;  %v896_v53 = vpop.f32.mrb[73].mxu1  ;;  %v1177_v54 = vpop.f32.mrb[98].mxu0 }
 0x1a6   :  { %v897_v12 = vpop.f32.mrb[74].mxu1  ;;  %v1905_v30 = vpop.f32.mrb[99].mxu0 }
 0x1a7   :  { %v2783_v26 = vadd.f32 %v2701_v35, %v895_v46  ;;  %v898_v28 = vadd.f32 %v2533_v52, %v897_v12  ;;  %v899_v41 = vpop.f32.mrb[75].mxu1 }
 0x1a9   :  { %3466 = vst [vmem:[#allocation5_spill] sm:$0xff] %v2783_v26  ;;  %v2787_v4 = vadd.f32 %v2704_v14, %v898_v28  ;;  %v1215_v53 = vadd.f32 %v1214_v44, %v2783_v26 }
 0x1ab   :  { %3467 = vst [vmem:[#allocation6_spill] sm:$0xff] %v2787_v4  ;;  %v1216_v28 = vadd.f32 %v1215_v53, %v2787_v4 }
 0x1ac   :  { %v902_v1 = vpop.f32.mrb[76].mxu1 }
 0x1ad   :  { %v903_v62 = vadd.f32 %v2533_v52, %v902_v1  ;;  %v904_v27 = vpop.f32.mrb[77].mxu1 }
 0x1ae   :  { %v905_v35 = vpop.f32.mrb[78].mxu1 }
 0x1af   :  { %v2793_v46 = vadd.f32 %v2716_v11, %v903_v62  ;;  %v906_v12 = vadd.f32 %v2533_v52, %v905_v35  ;;  %v907_v14 = vpop.f32.mrb[79].mxu1 }
 0x1b1   :  { %3468 = vst [vmem:[#allocation7_spill] sm:$0xff] %v2793_v46  ;;  %v1138_v49 = vadd.f32 %v2719_v19, %v906_v12  ;;  %v1217_v41 = vadd.f32 %v1216_v28, %v2793_v46 }
 0x1b3   :  { %v1218_v27 = vadd.f32 %v1217_v41, %v1138_v49 }
 0x1b4   :  { %v910_v23 = vpop.f32.mrb[80].mxu1 }
 0x1b5   :  { %v911_v44 = vadd.f32 %v2533_v52, %v910_v23  ;;  %v912_v54 = vpop.f32.mrb[81].mxu1 }
 0x1b6   :  { %v913_v1 = vpop.f32.mrb[82].mxu1 }
 0x1b7   :  { %v1143_v30 = vadd.f32 %v2731_v42, %v911_v44  ;;  %v914_v11 = vadd.f32 %v2533_v52, %v913_v1  ;;  %v915_v62 = vpop.f32.mrb[83].mxu1 }
 0x1b9   :  { %v1219_v26 = vadd.f32 %v1218_v27, %v1143_v30  ;;  %v1146_v35 = vadd.f32 %v2733_v55, %v914_v11 }
 0x1bb   :  { %v1220_v14 = vadd.f32 %v1219_v26, %v1146_v35 }
 0x1bc   :  { %v918_v53 = vpop.f32.mrb[84].mxu1 }
 0x1bd   :  { %v919_v19 = vadd.f32 %v2533_v52, %v918_v53  ;;  %v920_v12 = vpop.f32.mrb[85].mxu1 }
 0x1be   :  { %v921_v28 = vpop.f32.mrb[86].mxu1 }
 0x1bf   :  { %v1151_v46 = vadd.f32 %v2745_v16, %v919_v19  ;;  %v922_v23 = vadd.f32 %v2533_v52, %v921_v28  ;;  %v923_v54 = vpop.f32.mrb[87].mxu1 }
 0x1c1   :  { %v1221_v41 = vadd.f32 %v1220_v14, %v1151_v46  ;;  %v1154_v42 = vadd.f32 %v2748_v29, %v922_v23 }
 0x1c3   :  { %v1222_v44 = vadd.f32 %v1221_v41, %v1154_v42 }
 0x1c4   :  { %v926_v1 = vpop.f32.mrb[88].mxu1 }
 0x1c5   :  { %v927_v27 = vadd.f32 %v2533_v52, %v926_v1  ;;  %v928_v62 = vpop.f32.mrb[89].mxu1 }
 0x1c6   :  { %v929_v55 = vpop.f32.mrb[90].mxu1 }
 0x1c7   :  { %v1159_v26 = vadd.f32 %v2760_v3, %v927_v27  ;;  %v930_v11 = vadd.f32 %v2533_v52, %v929_v55  ;;  %v931_v53 = vpop.f32.mrb[91].mxu1 }
 0x1c9   :  { %v1223_v12 = vadd.f32 %v1222_v44, %v1159_v26  ;;  %v1162_v16 = vadd.f32 %v2763_v9, %v930_v11 }
 0x1cb   :  { %v1224_v19 = vadd.f32 %v1223_v12, %v1162_v16 }
 0x1cc   :  { %v934_v28 = vpop.f32.mrb[92].mxu1 }
 0x1cd   :  { %v935_v14 = vadd.f32 %v2533_v52, %v934_v28  ;;  %v936_v54 = vpop.f32.mrb[93].mxu1 }
 0x1ce   :  { %v937_v29 = vpop.f32.mrb[94].mxu1 }
 0x1cf   :  { %v1167_v23 = vadd.f32 %v2775_v37, %v935_v14  ;;  %v938_v41 = vadd.f32 %v2533_v52, %v937_v29  ;;  %v939_v1 = vpop.f32.mrb[95].mxu1 }
 0x1d1   :  { %v1225_v62 = vadd.f32 %v1224_v19, %v1167_v23  ;;  %v1170_v3 = vadd.f32 %v2777_v21, %v938_v41 }
 0x1d3   :  { %v1226_v27 = vadd.f32 %v1225_v62, %v1170_v3 }
 0x1d4   :  { %v942_v55 = vpop.f32.mrb[96].mxu1 }
 0x1d5   :  { %v943_v44 = vadd.f32 %v2533_v52, %v942_v55  ;;  %v944_v53 = vpop.f32.mrb[97].mxu1 }
 0x1d6   :  { %v945_v9 = vpop.f32.mrb[98].mxu1 }
 0x1d7   :  { %v1175_v11 = vadd.f32 %v1174_v58, %v943_v44  ;;  %v946_v12 = vpop.f32.mrb[99].mxu1 }
 0x1d9   :  { %v1227_v4 = vadd.f32 %v1226_v27, %v1175_v11 }
 0x1db   :  { %v1228_v28 = vrot.slane %v1227_v4, 4 }
 0x1dd   :  { %v1229_v54 = vadd.f32 %v1228_v28, %v1227_v4 }
 0x1df   :  { %v1230_v8 = vrot.slane %v1229_v54, 2 }
 0x1e1   :  { %v1231_v17 = vadd.f32 %v1230_v8, %v1229_v54 }
 0x1e3   :  { %v1232_v37 = vrot.slane %v1231_v17, 1 }
 0x1e5   :  { %v1233_v14 = vadd.f32 %v1232_v37, %v1231_v17 }
 0x1e7   :  { %v2816_v29 = vmul.f32 0.0025510204, %v1233_v14 }
 0x1e9   :  { %v2819_v19 = vsub.f32 %v1138_v49, %v2816_v29  ;;  %v2822_v21 = vsub.f32 %v1143_v30, %v2816_v29  ;;  %v2825_v52 = vsub.f32 %v1146_v35, %v2816_v29  ;;  %v2828_v58 = vsub.f32 %v1151_v46, %v2816_v29 }
 0x1ea   :  { %v2831_v4 = vsub.f32 %v1154_v42, %v2816_v29  ;;  %v2834_v8 = vsub.f32 %v1159_v26, %v2816_v29  ;;  %v2837_v17 = vsub.f32 %v1162_v16, %v2816_v29  ;;  %v2840_v49 = vsub.f32 %v1167_v23, %v2816_v29 }
 0x1eb   :  { %v2843_v30 = vsub.f32 %v1170_v3, %v2816_v29  ;;  %v2846_v35 = vsub.f32 %v1175_v11, %v2816_v29  ;;  %v2850_v46 = vsub.f32 %v2540_v61, %v2816_v29  ;;  %v2854_v42 = vsub.f32 %v2543_v0, %v2816_v29 }
 0x1ec   :  { %3469 = vst [vmem:[#allocation8_spill] sm:$0xff] %v2834_v8  ;;  %3470 = vst [vmem:[#allocation9_spill] sm:$0xff] %v2837_v17  ;;  %v2858_v26 = vsub.f32 %v2550_v10, %v2816_v29  ;;  %v2866_v41 = vsub.f32 %v2553_v13, %v2816_v29  ;;  %v2870_v61 = vsub.f32 %v2560_v22, %v2816_v29 }
 0x1ed   :  { %3471 = vst [vmem:[#allocation10_spill] sm:$0xff] %v2840_v49  ;;  %v1285_v16 = vmul.f32 %v2850_v46, %v2850_v46  ;;  %v1286_v23 = vmul.f32 %v2854_v42, %v2854_v42  ;;  %v2876_v10 = vsub.f32 %v2563_v24, %v2816_v29  ;;  %v2882_v13 = vsub.f32 %v2570_v33, %v2816_v29 }
 0x1ee   :  { %v1287_v0 = vmul.f32 %v2858_v26, %v2858_v26  ;;  %v1288_v62 = vmul.f32 %v2866_v41, %v2866_v41  ;;  %v1289_v22 = vmul.f32 %v2870_v61, %v2870_v61  ;;  %v2888_v55 = vsub.f32 %v2573_v36, %v2816_v29 }
 0x1ef   :  { %v1334_v1 = vadd.f32 %v1286_v23, %v1285_v16  ;;  %v1290_v24 = vmul.f32 %v2876_v10, %v2876_v10  ;;  %v2894_v53 = vsub.f32 %v2580_v47, %v2816_v29  ;;  %v1291_v33 = vmul.f32 %v2882_v13, %v2882_v13 }
 0x1f0   :  { %v2900_v11 = vsub.f32 %v2584_v51, %v2816_v29  ;;  %v1292_v36 = vmul.f32 %v2888_v55, %v2888_v55  ;;  %v2906_v28 = vsub.f32 %v2592_v48, %v2816_v29  ;;  %v2912_v37 = vsub.f32 %v2596_v50, %v2816_v29 }
 0x1f1   :  { %v1335_v3 = vadd.f32 %v1334_v1, %v1287_v0  ;;  %v1293_v47 = vmul.f32 %v2894_v53, %v2894_v53  ;;  %v2918_v16 = vsub.f32 %v2607_v18, %v2816_v29  ;;  %v2924_v0 = vsub.f32 %v2611_v20, %v2816_v29 }
 0x1f2   :  { %v1294_v51 = vmul.f32 %v2900_v11, %v2900_v11  ;;  %v1295_v48 = vmul.f32 %v2906_v28, %v2906_v28  ;;  %v1296_v50 = vmul.f32 %v2912_v37, %v2912_v37 }
 0x1f3   :  { %v1336_v27 = vadd.f32 %v1335_v3, %v1288_v62  ;;  %v2930_v62 = vsub.f32 %v2621_v34, %v2816_v29  ;;  %v1297_v18 = vmul.f32 %v2918_v16, %v2918_v16  ;;  %v1298_v20 = vmul.f32 %v2924_v0, %v2924_v0 }
 0x1f5   :  { %v1337_v44 = vadd.f32 %v1336_v27, %v1289_v22  ;;  %v2936_v22 = vsub.f32 %v2626_v39, %v2816_v29  ;;  %v1299_v34 = vmul.f32 %v2930_v62, %v2930_v62 }
 0x1f7   :  { %v1338_v9 = vadd.f32 %v1337_v44, %v1290_v24  ;;  %v2942_v24 = vsub.f32 %v2636_v59, %v2816_v29  ;;  %v1300_v39 = vmul.f32 %v2936_v22, %v2936_v22 }
 0x1f9   :  { %v1339_v12 = vadd.f32 %v1338_v9, %v1291_v33  ;;  %v2948_v33 = vsub.f32 %v2641_v63, %v2816_v29  ;;  %v1301_v59 = vmul.f32 %v2942_v24, %v2942_v24 }
 0x1fb   :  { %v1340_v54 = vadd.f32 %v1339_v12, %v1292_v36  ;;  %v2954_v36 = vsub.f32 %v2651_v56, %v2816_v29  ;;  %v1302_v63 = vmul.f32 %v2948_v33, %v2948_v33 }
 0x1fd   :  { %v1341_v14 = vadd.f32 %v1340_v54, %v1293_v47  ;;  %v2960_v47 = vsub.f32 %v2655_v2, %v2816_v29  ;;  %v1303_v56 = vmul.f32 %v2954_v36, %v2954_v36 }
 0x1ff   :  { %v1342_v23 = vadd.f32 %v1341_v14, %v1294_v51  ;;  %v2966_v51 = vsub.f32 %v2665_v38, %v2816_v29  ;;  %v1304_v2 = vmul.f32 %v2960_v47, %v2960_v47 }
 0x201   :  { %v1343_v1 = vadd.f32 %v1342_v23, %v1295_v48  ;;  %v2972_v48 = vsub.f32 %v2670_v45, %v2816_v29  ;;  %v1305_v38 = vmul.f32 %v2966_v51, %v2966_v51 }
 0x203   :  { %v1344_v3 = vadd.f32 %v1343_v1, %v1296_v50  ;;  %v2978_v50 = vsub.f32 %v2680_v7, %v2816_v29  ;;  %v1306_v45 = vmul.f32 %v2972_v48, %v2972_v48 }
 0x205   :  { %v1345_v27 = vadd.f32 %v1344_v3, %v1297_v18  ;;  %v2984_v18 = vsub.f32 %v2685_v25, %v2816_v29  ;;  %v1307_v7 = vmul.f32 %v2978_v50, %v2978_v50 }
 0x207   :  { %v1346_v44 = vadd.f32 %v1345_v27, %v1298_v20  ;;  %v2990_v20 = vsub.f32 %v2695_v32, %v2816_v29  ;;  %v1308_v25 = vmul.f32 %v2984_v18, %v2984_v18 }
 0x209   :  { %v1347_v9 = vadd.f32 %v1346_v44, %v1299_v34  ;;  %v2996_v34 = vsub.f32 %v2699_v5, %v2816_v29  ;;  %v1309_v32 = vmul.f32 %v2990_v20, %v2990_v20 }
 0x20b   :  { %v1348_v12 = vadd.f32 %v1347_v9, %v1300_v39  ;;  %v3002_v39 = vsub.f32 %v2709_v60, %v2816_v29  ;;  %v1310_v5 = vmul.f32 %v2996_v34, %v2996_v34 }
 0x20d   :  { %v1349_v54 = vadd.f32 %v1348_v12, %v1301_v59  ;;  %v3008_v59 = vsub.f32 %v2714_v57, %v2816_v29  ;;  %v1311_v60 = vmul.f32 %v3002_v39, %v3002_v39 }
 0x20f   :  { %v1350_v14 = vadd.f32 %v1349_v54, %v1302_v63  ;;  %v3014_v63 = vsub.f32 %v2724_v31, %v2816_v29  ;;  %v1312_v57 = vmul.f32 %v3008_v59, %v3008_v59 }
 0x211   :  { %v1351_v23 = vadd.f32 %v1350_v14, %v1303_v56  ;;  %v3020_v56 = vsub.f32 %v2729_v40, %v2816_v29  ;;  %v1313_v31 = vmul.f32 %v3014_v63, %v3014_v63 }
 0x213   :  { %v1352_v1 = vadd.f32 %v1351_v23, %v1304_v2  ;;  %v3026_v2 = vsub.f32 %v2739_v6, %v2816_v29  ;;  %v1314_v40 = vmul.f32 %v3020_v56, %v3020_v56 }
 0x215   :  { %v1353_v3 = vadd.f32 %v1352_v1, %v1305_v38  ;;  %v3032_v38 = vsub.f32 %v2743_v15, %v2816_v29  ;;  %v1315_v6 = vmul.f32 %v3026_v2, %v3026_v2 }
 0x217   :  { %v1354_v27 = vadd.f32 %v1353_v3, %v1306_v45  ;;  %v3038_v45 = vsub.f32 %v2753_v43, %v2816_v29  ;;  %v1316_v15 = vmul.f32 %v3032_v38, %v3032_v38 }
 0x219   :  { %v1355_v44 = vadd.f32 %v1354_v27, %v1307_v7  ;;  %v3472_v7 = vld [vmem:[#allocation2_spill] sm:$0xff]  ;;  %v1317_v43 = vmul.f32 %v3038_v45, %v3038_v45 }
 0x21a   :  { %v3044_v27 = vsub.f32 %v3472_v7, %v2816_v29  ;;  %v3477_v7 = vld [vmem:[#allocation7_spill] sm:$0xff] }
 0x21b   :  { %v1356_v9 = vadd.f32 %v1355_v44, %v1308_v25  ;;  %v3473_v44 = vld [vmem:[#allocation3_spill] sm:$0xff] }
 0x21d   :  { %v1357_v12 = vadd.f32 %v1356_v9, %v1309_v32  ;;  %v3050_v32 = vsub.f32 %v3473_v44, %v2816_v29 }
 0x21f   :  { %v1358_v54 = vadd.f32 %v1357_v12, %v1310_v5  ;;  %v3474_v5 = vld [vmem:[#allocation4_spill] sm:$0xff] }
 0x220   :  { %v3056_v12 = vsub.f32 %v3474_v5, %v2816_v29 }
 0x221   :  { %v1359_v14 = vadd.f32 %v1358_v54, %v1311_v60  ;;  %v1318_v60 = vmul.f32 %v3044_v27, %v3044_v27 }
 0x223   :  { %v1360_v23 = vadd.f32 %v1359_v14, %v1312_v57  ;;  %v3475_v57 = vld [vmem:[#allocation5_spill] sm:$0xff] }
 0x224   :  { %v3062_v14 = vsub.f32 %v3475_v57, %v2816_v29 }
 0x225   :  { %v1361_v1 = vadd.f32 %v1360_v23, %v1313_v31  ;;  %v1319_v31 = vmul.f32 %v3050_v32, %v3050_v32 }
 0x227   :  { %v1362_v3 = vadd.f32 %v1361_v1, %v1314_v40  ;;  %v3476_v40 = vld [vmem:[#allocation6_spill] sm:$0xff] }
 0x228   :  { %v3068_v1 = vsub.f32 %v3476_v40, %v2816_v29 }
 0x229   :  { %v1363_v25 = vadd.f32 %v1362_v3, %v1315_v6  ;;  %v1320_v6 = vmul.f32 %v3056_v12, %v3056_v12 }
 0x22b   :  { %v1364_v9 = vadd.f32 %v1363_v25, %v1316_v15  ;;  %v3074_v15 = vsub.f32 %v3477_v7, %v2816_v29  ;;  %v1321_v25 = vmul.f32 %v3062_v14, %v3062_v14  ;;  %v1325_v29 = vmul.f32 %v2822_v21, %v2822_v21 }
 0x22c   :  { %v1328_v7 = vmul.f32 %v2831_v4, %v2831_v4 }
 0x22d   :  { %v1365_v54 = vadd.f32 %v1364_v9, %v1317_v43  ;;  %v1322_v43 = vmul.f32 %v3068_v1, %v3068_v1  ;;  %v1323_v5 = vmul.f32 %v3074_v15, %v3074_v15 }
 0x22f   :  { %v1366_v23 = vadd.f32 %v1365_v54, %v1318_v60  ;;  %v1324_v54 = vmul.f32 %v2819_v19, %v2819_v19 }
 0x231   :  { %v1367_v3 = vadd.f32 %v1366_v23, %v1319_v31  ;;  %v1326_v23 = vmul.f32 %v2825_v52, %v2825_v52 }
 0x233   :  { %v1368_v44 = vadd.f32 %v1367_v3, %v1320_v6  ;;  %v1327_v6 = vmul.f32 %v2828_v58, %v2828_v58 }
 0x235   :  { %v1369_v9 = vadd.f32 %v1368_v44, %v1321_v25  ;;  %v1329_v44 = vmul.f32 %v2834_v8, %v2834_v8 }
 0x237   :  { %v1370_v60 = vadd.f32 %v1369_v9, %v1322_v43  ;;  %v1330_v9 = vmul.f32 %v2837_v17, %v2837_v17 }
 0x239   :  { %v1371_v57 = vadd.f32 %v1370_v60, %v1323_v5  ;;  %v1331_v60 = vmul.f32 %v2840_v49, %v2840_v49 }
 0x23b   :  { %v1372_v31 = vadd.f32 %v1371_v57, %v1324_v54  ;;  %v1332_v57 = vmul.f32 %v2843_v30, %v2843_v30 }
 0x23d   :  { %v1373_v40 = vadd.f32 %v1372_v31, %v1325_v29  ;;  %v1333_v31 = vmul.f32 %v2846_v35, %v2846_v35 }
 0x23f   :  { %v1374_v3 = vadd.f32 %v1373_v40, %v1326_v23 }
 0x241   :  { %v1375_v25 = vadd.f32 %v1374_v3, %v1327_v6 }
 0x243   :  { %v1376_v43 = vadd.f32 %v1375_v25, %v1328_v7 }
 0x245   :  { %v1377_v5 = vadd.f32 %v1376_v43, %v1329_v44 }
 0x247   :  { %v1378_v54 = vadd.f32 %v1377_v5, %v1330_v9 }
 0x249   :  { %v1379_v29 = vadd.f32 %v1378_v54, %v1331_v60 }
 0x24b   :  { %v1380_v23 = vadd.f32 %v1379_v29, %v1332_v57 }
 0x24d   :  { %v1381_v40 = vadd.f32 %v1380_v23, %v1333_v31 }
 0x24f   :  { %v1382_v6 = vrot.slane %v1381_v40, 4 }
 0x251   :  { %v1383_v3 = vadd.f32 %v1382_v6, %v1381_v40  ;;  %v3479_v40 = vld [vmem:[#allocation9_spill] sm:$0xff]  ;;  %v3480_v6 = vld [vmem:[#allocation10_spill] sm:$0xff] }
 0x253   :  { %v1384_v7 = vrot.slane %v1383_v3, 2 }
 0x255   :  { %v1385_v25 = vadd.f32 %v1384_v7, %v1383_v3 }
 0x257   :  { %v1386_v8 = vrot.slane %v1385_v25, 1 }
 0x259   :  { %v1387_v17 = vadd.f32 %v1386_v8, %v1385_v25 }
 0x25b   :  { %v1388_v44 = vmul.f32 0.0025510204, %v1387_v17 }
 0x25d   :  { %v1389_v43 = vadd.f32 1e-05, %v1388_v44 }
 0x25f   :  { %2124 = vrsqrt.f32 %v1389_v43 }
 0x269   :  { %v2125_v49 = vpop.eup %2124 }
 0x26a   :  { %v1391_v9 = vmul.f32 %v2125_v49, %v2850_v46  ;;  %v1392_v5 = vmul.f32 %v2125_v49, %v2854_v42  ;;  %v1393_v60 = vmul.f32 %v2125_v49, %v2858_v26  ;;  %v1394_v54 = vmul.f32 %v2125_v49, %v2866_v41 }
 0x26b   :  { %v1395_v57 = vmul.f32 %v2125_v49, %v2870_v61  ;;  %v1396_v29 = vmul.f32 %v2125_v49, %v2876_v10  ;;  %v1397_v31 = vmul.f32 %v2125_v49, %v2882_v13  ;;  %v1398_v8 = vmul.f32 %v2125_v49, %v2888_v55 }
 0x26c   :  { %v1399_v17 = vmul.f32 %v2125_v49, %v2894_v53  ;;  %v1400_v23 = vmul.f32 %v2125_v49, %v2900_v11  ;;  %v1401_v46 = vmul.f32 %v2125_v49, %v2906_v28  ;;  %v1402_v42 = vmul.f32 %v2125_v49, %v2912_v37 }
 0x26d   :  { %v1403_v26 = vmul.f32 %v2125_v49, %v2918_v16  ;;  %v1404_v41 = vmul.f32 %v2125_v49, %v2924_v0  ;;  %v1405_v61 = vmul.f32 %v2125_v49, %v2930_v62  ;;  %v1406_v10 = vmul.f32 %v2125_v49, %v2936_v22 }
 0x26e   :  { %v1407_v13 = vmul.f32 %v2125_v49, %v2942_v24  ;;  %v1408_v55 = vmul.f32 %v2125_v49, %v2948_v33  ;;  %v1409_v53 = vmul.f32 %v2125_v49, %v2954_v36  ;;  %v1410_v11 = vmul.f32 %v2125_v49, %v2960_v47 }
 0x26f   :  { %v1411_v28 = vmul.f32 %v2125_v49, %v2966_v51  ;;  %v1412_v37 = vmul.f32 %v2125_v49, %v2972_v48  ;;  %v1413_v16 = vmul.f32 %v2125_v49, %v2978_v50  ;;  %v1414_v0 = vmul.f32 %v2125_v49, %v2984_v18 }
 0x270   :  { %v1415_v62 = vmul.f32 %v2125_v49, %v2990_v20  ;;  %v1416_v22 = vmul.f32 %v2125_v49, %v2996_v34  ;;  %v1417_v24 = vmul.f32 %v2125_v49, %v3002_v39  ;;  %v1418_v33 = vmul.f32 %v2125_v49, %v3008_v59 }
 0x271   :  { %v1419_v36 = vmul.f32 %v2125_v49, %v3014_v63  ;;  %v1420_v47 = vmul.f32 %v2125_v49, %v3020_v56  ;;  %v1421_v51 = vmul.f32 %v2125_v49, %v3026_v2  ;;  %v1422_v48 = vmul.f32 %v2125_v49, %v3032_v38  ;;  %v1773_v2 = vld [vmem:[%s3451_s3] ss:$0 sm:$0xff] }
 0x272   :  { %v1423_v50 = vmul.f32 %v2125_v49, %v3038_v45  ;;  %v1424_v18 = vmul.f32 %v2125_v49, %v3044_v27  ;;  %v1425_v20 = vmul.f32 %v2125_v49, %v3050_v32  ;;  %v1426_v34 = vmul.f32 %v2125_v49, %v3056_v12  ;;  %v3478_v12 = vld [vmem:[#allocation8_spill] sm:$0xff] }
 0x273   :  { %v1427_v39 = vmul.f32 %v2125_v49, %v3062_v14  ;;  %v1428_v59 = vmul.f32 %v2125_v49, %v3068_v1  ;;  %v1429_v63 = vmul.f32 %v2125_v49, %v3074_v15  ;;  %v1430_v56 = vmul.f32 %v2125_v49, %v2819_v19 }
 0x274   :  { %v1431_v38 = vmul.f32 %v2125_v49, %v2822_v21  ;;  %v1432_v45 = vmul.f32 %v2125_v49, %v2825_v52  ;;  %v1433_v27 = vmul.f32 %v2125_v49, %v2828_v58  ;;  %v1434_v32 = vmul.f32 %v2125_v49, %v2831_v4 }
 0x275   :  { %v1435_v14 = vmul.f32 %v2125_v49, %v3478_v12  ;;  %v1436_v1 = vmul.f32 %v2125_v49, %v3479_v40  ;;  %v1437_v15 = vmul.f32 %v2125_v49, %v3480_v6  ;;  %v1438_v19 = vmul.f32 %v2125_v49, %v2843_v30 }
 0x276   :  { %v1439_v3 = vmul.f32 %v2125_v49, %v2846_v35  ;;  %v1447_v7 = vmul.f32 %v1773_v2, %v1391_v9  ;;  %v1448_v25 = vmul.f32 %v1773_v2, %v1392_v5  ;;  %v1449_v44 = vmul.f32 %v1773_v2, %v1393_v60 }
 0x277   :  { %v1450_v21 = vmul.f32 %v1773_v2, %v1394_v54  ;;  %v1451_v43 = vmul.f32 %v1773_v2, %v1395_v57  ;;  %v1452_v52 = vmul.f32 %v1773_v2, %v1396_v29  ;;  %v1453_v58 = vmul.f32 %v1773_v2, %v1397_v31 }
 0x278   :  { %v1454_v4 = vmul.f32 %v1773_v2, %v1398_v8  ;;  %v1455_v12 = vmul.f32 %v1773_v2, %v1399_v17  ;;  %v1456_v40 = vmul.f32 %v1773_v2, %v1400_v23  ;;  %v1457_v6 = vmul.f32 %v1773_v2, %v1401_v46 }
 0x279   :  { %v1458_v30 = vmul.f32 %v1773_v2, %v1402_v42  ;;  %v1459_v35 = vmul.f32 %v1773_v2, %v1403_v26  ;;  %v1460_v49 = vmul.f32 %v1773_v2, %v1404_v41  ;;  %v1461_v9 = vmul.f32 %v1773_v2, %v1405_v61 }
 0x27a   :  { %v1462_v5 = vmul.f32 %v1773_v2, %v1406_v10  ;;  %v1463_v60 = vmul.f32 %v1773_v2, %v1407_v13  ;;  %v1464_v54 = vmul.f32 %v1773_v2, %v1408_v55  ;;  %v1465_v57 = vmul.f32 %v1773_v2, %v1409_v53 }
 0x27b   :  { %v1466_v29 = vmul.f32 %v1773_v2, %v1410_v11  ;;  %v1467_v31 = vmul.f32 %v1773_v2, %v1411_v28  ;;  %v1468_v8 = vmul.f32 %v1773_v2, %v1412_v37  ;;  %v1469_v17 = vmul.f32 %v1773_v2, %v1413_v16 }
 0x27c   :  { %v1470_v23 = vmul.f32 %v1773_v2, %v1414_v0  ;;  %v1471_v46 = vmul.f32 %v1773_v2, %v1415_v62  ;;  %v1472_v42 = vmul.f32 %v1773_v2, %v1416_v22  ;;  %v1473_v26 = vmul.f32 %v1773_v2, %v1417_v24  ;;  %v1774_v22 = vld [vmem:[%s3452_s4] ss:$0 sm:$0xff] }
 0x27d   :  { %v1474_v41 = vmul.f32 %v1773_v2, %v1418_v33  ;;  %v1475_v61 = vmul.f32 %v1773_v2, %v1419_v36  ;;  %v1476_v10 = vmul.f32 %v1773_v2, %v1420_v47  ;;  %v1477_v13 = vmul.f32 %v1773_v2, %v1421_v51 }
 0x27e   :  { %v1478_v55 = vmul.f32 %v1773_v2, %v1422_v48  ;;  %v1479_v53 = vmul.f32 %v1773_v2, %v1423_v50  ;;  %v1480_v11 = vmul.f32 %v1773_v2, %v1424_v18  ;;  %v1481_v28 = vmul.f32 %v1773_v2, %v1425_v20 }
 0x27f   :  { %v1482_v37 = vmul.f32 %v1773_v2, %v1426_v34  ;;  %v1483_v16 = vmul.f32 %v1773_v2, %v1427_v39  ;;  %v1484_v0 = vmul.f32 %v1773_v2, %v1428_v59  ;;  %v1485_v62 = vmul.f32 %v1773_v2, %v1429_v63 }
 0x280   :  { %v1486_v24 = vmul.f32 %v1773_v2, %v1430_v56  ;;  %v1487_v33 = vmul.f32 %v1773_v2, %v1431_v38  ;;  %v1488_v36 = vmul.f32 %v1773_v2, %v1432_v45  ;;  %v1489_v47 = vmul.f32 %v1773_v2, %v1433_v27 }
 0x281   :  { %v1490_v51 = vmul.f32 %v1773_v2, %v1434_v32  ;;  %v1491_v48 = vmul.f32 %v1773_v2, %v1435_v14  ;;  %v1492_v50 = vmul.f32 %v1773_v2, %v1436_v1  ;;  %v1493_v18 = vmul.f32 %v1773_v2, %v1437_v15 }
 0x282   :  { %v1494_v20 = vmul.f32 %v1773_v2, %v1438_v19  ;;  %v1495_v34 = vmul.f32 %v1773_v2, %v1439_v3  ;;  %v1503_v39 = vadd.f32 %v1774_v22, %v1447_v7  ;;  %v3157_v59 = vadd.f32 %v1774_v22, %v1448_v25 }
 0x283   :  { %v3159_v63 = vadd.f32 %v1774_v22, %v1449_v44  ;;  %v3161_v56 = vadd.f32 %v1774_v22, %v1450_v21  ;;  %v3163_v38 = vadd.f32 %v1774_v22, %v1451_v43  ;;  %v3165_v45 = vadd.f32 %v1774_v22, %v1452_v52 }
 0x284   :  { %v3167_v27 = vadd.f32 %v1774_v22, %v1453_v58  ;;  %v3169_v32 = vadd.f32 %v1774_v22, %v1454_v4  ;;  %v3171_v14 = vadd.f32 %v1774_v22, %v1455_v12  ;;  %v3173_v1 = vadd.f32 %v1774_v22, %v1456_v40 }
 0x285   :  { %v3175_v2 = vadd.f32 %v1774_v22, %v1457_v6  ;;  %v3177_v15 = vadd.f32 %v1774_v22, %v1458_v30  ;;  %v3179_v19 = vadd.f32 %v1774_v22, %v1459_v35  ;;  %v3181_v3 = vadd.f32 %v1774_v22, %v1460_v49 }
 0x286   :  { %v3183_v7 = vadd.f32 %v1774_v22, %v1461_v9  ;;  %v3185_v25 = vadd.f32 %v1774_v22, %v1462_v5  ;;  %v3187_v44 = vadd.f32 %v1774_v22, %v1463_v60  ;;  %v3189_v21 = vadd.f32 %v1774_v22, %v1464_v54 }
 0x287   :  { %v3191_v43 = vadd.f32 %v1774_v22, %v1465_v57  ;;  %v3193_v52 = vadd.f32 %v1774_v22, %v1466_v29  ;;  %v3195_v58 = vadd.f32 %v1774_v22, %v1467_v31  ;;  %v3197_v4 = vadd.f32 %v1774_v22, %v1468_v8 }
 0x288   :  { %v3199_v12 = vadd.f32 %v1774_v22, %v1469_v17  ;;  %v3201_v40 = vadd.f32 %v1774_v22, %v1470_v23  ;;  %v3203_v6 = vadd.f32 %v1774_v22, %v1471_v46  ;;  %v3205_v30 = vadd.f32 %v1774_v22, %v1472_v42 }
 0x289   :  { %v3207_v35 = vadd.f32 %v1774_v22, %v1473_v26  ;;  %v3209_v49 = vadd.f32 %v1774_v22, %v1474_v41  ;;  %v3211_v9 = vadd.f32 %v1774_v22, %v1475_v61  ;;  %v3213_v5 = vadd.f32 %v1774_v22, %v1476_v10 }
 0x28a   :  { %v3215_v60 = vadd.f32 %v1774_v22, %v1477_v13  ;;  %v3217_v54 = vadd.f32 %v1774_v22, %v1478_v55  ;;  %v3219_v57 = vadd.f32 %v1774_v22, %v1479_v53  ;;  %v3221_v29 = vadd.f32 %v1774_v22, %v1480_v11 }
 0x28b   :  { %v3223_v31 = vadd.f32 %v1774_v22, %v1481_v28  ;;  %v3225_v8 = vadd.f32 %v1774_v22, %v1482_v37  ;;  %v3227_v17 = vadd.f32 %v1774_v22, %v1483_v16  ;;  %v3229_v23 = vadd.f32 %v1774_v22, %v1484_v0 }
 0x28c   :  { %v3231_v46 = vadd.f32 %v1774_v22, %v1485_v62  ;;  %v3233_v42 = vadd.f32 %v1774_v22, %v1486_v24  ;;  %v3235_v26 = vadd.f32 %v1774_v22, %v1487_v33  ;;  %v3237_v41 = vadd.f32 %v1774_v22, %v1488_v36 }
 0x28d   :  { %v3239_v61 = vadd.f32 %v1774_v22, %v1489_v47  ;;  %v3241_v10 = vadd.f32 %v1774_v22, %v1490_v51  ;;  %v3243_v13 = vadd.f32 %v1774_v22, %v1491_v48  ;;  %v3245_v55 = vadd.f32 %v1774_v22, %v1492_v50 }
 0x28e   :  { %v3247_v53 = vadd.f32 %v1774_v22, %v1493_v18  ;;  %v3249_v11 = vadd.f32 %v1774_v22, %v1494_v20  ;;  %v3251_v28 = vadd.f32 %v1774_v22, %v1495_v34  ;;  %v1552_v37 = vmax.f32 %v1503_v39, 0.0 }
 0x28f   :  { %v1553_v16 = vmax.f32 %v3157_v59, 0.0  ;;  %v1554_v0 = vmax.f32 %v3159_v63, 0.0  ;;  %v1555_v62 = vmax.f32 %v3161_v56, 0.0  ;;  %v1556_v24 = vmax.f32 %v3163_v38, 0.0 }
 0x290   :  { %v1557_v33 = vmax.f32 %v3165_v45, 0.0  ;;  %v1558_v36 = vmax.f32 %v3167_v27, 0.0  ;;  %v1559_v47 = vmax.f32 %v3169_v32, 0.0  ;;  %v1560_v51 = vmax.f32 %v3171_v14, 0.0  ;;  %1601 = vst [vmem:[%s3453_s5] sm:$0xff] %v1552_v37 }
 0x291   :  { %v1561_v22 = vmax.f32 %v3173_v1, 0.0  ;;  %v1562_v48 = vmax.f32 %v3175_v2, 0.0  ;;  %v1563_v50 = vmax.f32 %v3177_v15, 0.0  ;;  %v1564_v18 = vmax.f32 %v3179_v19, 0.0  ;;  %1602 = vst [vmem:[%s3453_s5 + $0x8] sm:$0xff] %v1553_v16  ;;  %1603 = vst [vmem:[%s3453_s5 + $0x10] sm:$0xff] %v1554_v0 }
 0x292   :  { %1604 = vst [vmem:[%s3453_s5 + $0x18] sm:$0xff] %v1555_v62  ;;  %1605 = vst [vmem:[%s3453_s5 + $0x20] sm:$0xff] %v1556_v24  ;;  %v1565_v20 = vmax.f32 %v3181_v3, 0.0  ;;  %v1566_v34 = vmax.f32 %v3183_v7, 0.0  ;;  %v1567_v39 = vmax.f32 %v3185_v25, 0.0  ;;  %v1568_v59 = vmax.f32 %v3187_v44, 0.0 }
 0x293   :  { %1606 = vst [vmem:[%s3453_s5 + $0x28] sm:$0xff] %v1557_v33  ;;  %1607 = vst [vmem:[%s3453_s5 + $0x30] sm:$0xff] %v1558_v36  ;;  %v1569_v63 = vmax.f32 %v3189_v21, 0.0  ;;  %v1570_v56 = vmax.f32 %v3191_v43, 0.0  ;;  %v1571_v38 = vmax.f32 %v3193_v52, 0.0  ;;  %v1572_v45 = vmax.f32 %v3195_v58, 0.0 }
 0x294   :  { %1608 = vst [vmem:[%s3453_s5 + $0x38] sm:$0xff] %v1559_v47  ;;  %1609 = vst [vmem:[%s3453_s5 + $0x40] sm:$0xff] %v1560_v51  ;;  %v1573_v27 = vmax.f32 %v3197_v4, 0.0  ;;  %v1574_v32 = vmax.f32 %v3199_v12, 0.0  ;;  %v1575_v14 = vmax.f32 %v3201_v40, 0.0  ;;  %v1576_v1 = vmax.f32 %v3203_v6, 0.0 }
 0x295   :  { %1610 = vst [vmem:[%s3453_s5 + $0x48] sm:$0xff] %v1561_v22  ;;  %1611 = vst [vmem:[%s3453_s5 + $0x50] sm:$0xff] %v1562_v48  ;;  %v1577_v2 = vmax.f32 %v3205_v30, 0.0  ;;  %v1578_v15 = vmax.f32 %v3207_v35, 0.0  ;;  %v1579_v19 = vmax.f32 %v3209_v49, 0.0  ;;  %v1580_v3 = vmax.f32 %v3211_v9, 0.0 }
 0x296   :  { %1612 = vst [vmem:[%s3453_s5 + $0x58] sm:$0xff] %v1563_v50  ;;  %1613 = vst [vmem:[%s3453_s5 + $0x60] sm:$0xff] %v1564_v18  ;;  %v1581_v7 = vmax.f32 %v3213_v5, 0.0  ;;  %v1582_v25 = vmax.f32 %v3215_v60, 0.0  ;;  %v1583_v44 = vmax.f32 %v3217_v54, 0.0  ;;  %v1584_v21 = vmax.f32 %v3219_v57, 0.0 }
 0x297   :  { %1614 = vst [vmem:[%s3453_s5 + $0x68] sm:$0xff] %v1565_v20  ;;  %1615 = vst [vmem:[%s3453_s5 + $0x70] sm:$0xff] %v1566_v34  ;;  %v1585_v43 = vmax.f32 %v3221_v29, 0.0  ;;  %v1586_v52 = vmax.f32 %v3223_v31, 0.0  ;;  %v1587_v58 = vmax.f32 %v3225_v8, 0.0  ;;  %v1588_v4 = vmax.f32 %v3227_v17, 0.0 }
 0x298   :  { %1616 = vst [vmem:[%s3453_s5 + $0x78] sm:$0xff] %v1567_v39  ;;  %1617 = vst [vmem:[%s3453_s5 + $0x80] sm:$0xff] %v1568_v59  ;;  %v1589_v12 = vmax.f32 %v3229_v23, 0.0  ;;  %v1590_v40 = vmax.f32 %v3231_v46, 0.0  ;;  %v1591_v6 = vmax.f32 %v3233_v42, 0.0  ;;  %v1592_v30 = vmax.f32 %v3235_v26, 0.0 }
 0x299   :  { %1618 = vst [vmem:[%s3453_s5 + $0x88] sm:$0xff] %v1569_v63  ;;  %1619 = vst [vmem:[%s3453_s5 + $0x90] sm:$0xff] %v1570_v56  ;;  %v1593_v35 = vmax.f32 %v3237_v41, 0.0  ;;  %v1594_v49 = vmax.f32 %v3239_v61, 0.0  ;;  %v1595_v9 = vmax.f32 %v3241_v10, 0.0  ;;  %v1596_v5 = vmax.f32 %v3243_v13, 0.0 }
 0x29a   :  { %1620 = vst [vmem:[%s3453_s5 + $0x98] sm:$0xff] %v1571_v38  ;;  %1621 = vst [vmem:[%s3453_s5 + $0xa0] sm:$0xff] %v1572_v45  ;;  %v1597_v60 = vmax.f32 %v3245_v55, 0.0  ;;  %v1598_v54 = vmax.f32 %v3247_v53, 0.0  ;;  %v1599_v57 = vmax.f32 %v3249_v11, 0.0  ;;  %v1600_v29 = vmax.f32 %v3251_v28, 0.0 }
 0x29b   :  { %1622 = vst [vmem:[%s3453_s5 + $0xa8] sm:$0xff] %v1573_v27  ;;  %1623 = vst [vmem:[%s3453_s5 + $0xb0] sm:$0xff] %v1574_v32 }
 0x29c   :  { %1624 = vst [vmem:[%s3453_s5 + $0xb8] sm:$0xff] %v1575_v14  ;;  %1625 = vst [vmem:[%s3453_s5 + $0xc0] sm:$0xff] %v1576_v1 }
 0x29d   :  { %1626 = vst [vmem:[%s3453_s5 + $0xc8] sm:$0xff] %v1577_v2  ;;  %1627 = vst [vmem:[%s3453_s5 + $0xd0] sm:$0xff] %v1578_v15 }
 0x29e   :  { %1628 = vst [vmem:[%s3453_s5 + $0xd8] sm:$0xff] %v1579_v19  ;;  %1629 = vst [vmem:[%s3453_s5 + $0xe0] sm:$0xff] %v1580_v3 }
 0x29f   :  { %1630 = vst [vmem:[%s3453_s5 + $0xe8] sm:$0xff] %v1581_v7  ;;  %1631 = vst [vmem:[%s3453_s5 + $0xf0] sm:$0xff] %v1582_v25 }
 0x2a0   :  { %1632 = vst [vmem:[%s3453_s5 + $0xf8] sm:$0xff] %v1583_v44  ;;  %1633 = vst [vmem:[%s3453_s5 + $0x100] sm:$0xff] %v1584_v21 }
 0x2a1   :  { %1634 = vst [vmem:[%s3453_s5 + $0x108] sm:$0xff] %v1585_v43  ;;  %1635 = vst [vmem:[%s3453_s5 + $0x110] sm:$0xff] %v1586_v52 }
 0x2a2   :  { %1636 = vst [vmem:[%s3453_s5 + $0x118] sm:$0xff] %v1587_v58  ;;  %1637 = vst [vmem:[%s3453_s5 + $0x120] sm:$0xff] %v1588_v4 }
 0x2a3   :  { %1638 = vst [vmem:[%s3453_s5 + $0x128] sm:$0xff] %v1589_v12  ;;  %1639 = vst [vmem:[%s3453_s5 + $0x130] sm:$0xff] %v1590_v40 }
 0x2a4   :  { %1640 = vst [vmem:[%s3453_s5 + $0x138] sm:$0xff] %v1591_v6  ;;  %1641 = vst [vmem:[%s3453_s5 + $0x140] sm:$0xff] %v1592_v30 }
 0x2a5   :  { %1642 = vst [vmem:[%s3453_s5 + $0x148] sm:$0xff] %v1593_v35  ;;  %1643 = vst [vmem:[%s3453_s5 + $0x150] sm:$0xff] %v1594_v49 }
 0x2a6   :  { %1644 = vst [vmem:[%s3453_s5 + $0x158] sm:$0xff] %v1595_v9  ;;  %1645 = vst [vmem:[%s3453_s5 + $0x160] sm:$0xff] %v1596_v5 }
 0x2a7   :  { %1646 = vst [vmem:[%s3453_s5 + $0x168] sm:$0xff] %v1597_v60  ;;  %1647 = vst [vmem:[%s3453_s5 + $0x170] sm:$0xff] %v1598_v54 }
 0x2a8   :  { %1648 = vst [vmem:[%s3453_s5 + $0x178] sm:$0xff] %v1599_v57  ;;  %1649 = vst [vmem:[%s3453_s5 + $0x180] sm:$0xff] %v1600_v29 }

</bundles_post_ra>
